<compile_context>
chip_gen: v7x
topology: tpu7x:2x2x1
jax: 0.10.0
libtpu: 0.0.40
codegen_flags: <defaults>
</compile_context>

<pallas_src>
import functools

import jax
import jax.numpy as jnp
from jax.experimental import pallas as pl
from jax.experimental.pallas import tpu as pltpu

BN_EPS = 1e-5
LANE = 128   # lane width
SUB = 8      # sublane width


def _round_up(x, m):
    return (x + m - 1) // m * m


def _pad2(x, rows, cols):
    pr, pc = rows - x.shape[0], cols - x.shape[1]
    if pr == 0 and pc == 0:
        return x
    return jnp.pad(x, ((0, pr), (0, pc)))


def _pad_rows(x, rows):
    if x.shape[0] == rows:
        return x
    return jnp.pad(x, ((0, rows - x.shape[0]), (0, 0)))


# ----------------------------- kernels -----------------------------

def _tile_partial_stats(h, psum_ref, psq_ref, e_valid, needs_mask):
    """Per-tile partial sum / sum-of-squares of h, kept as (8, Hp) sublane groups.

    Rows >= e_valid (padding rows) are masked out so global BN stats stay exact.
    The final 8->1 sublane reduction is done in the wrapper on a tiny array.
    """
    te, hp = h.shape
    if needs_mask:
        rows = pl.program_id(0) * te + jax.lax.broadcasted_iota(jnp.int32, (te, 1), 0)
        hm = h * (rows < e_valid).astype(h.dtype)
    else:
        hm = h
    psum_ref[0] = hm.reshape(te // SUB, SUB, hp).sum(axis=0)
    psq_ref[0] = (hm * h).reshape(te // SUB, SUB, hp).sum(axis=0)


def _linear0_stats_kernel(src_ref, dst_ref, ea_ref, w0a_ref, w0b_ref, w0c_ref, b0_ref,
                          h0_ref, psum_ref, psq_ref, *, e_valid, needs_mask):
    # Split first matmul replaces cat([src, dest, ea], dim=1) @ W0 — MXU accumulation
    # is free and avoids materializing the (TE, 96) concat.
    h = jnp.dot(src_ref[...], w0a_ref[...], preferred_element_type=jnp.float32)
    h = h + jnp.dot(dst_ref[...], w0b_ref[...], preferred_element_type=jnp.float32)
    h = h + jnp.dot(ea_ref[...], w0c_ref[...], preferred_element_type=jnp.float32)
    h = h + b0_ref[...]
    h0_ref[...] = h
    _tile_partial_stats(h, psum_ref, psq_ref, e_valid, needs_mask)


def _bn_relu_linear_stats_kernel(h_ref, sc_ref, sh_ref, w_ref, b_ref,
                                 hout_ref, psum_ref, psq_ref, *, e_valid, needs_mask):
    # BN apply is pre-folded to a single scale/shift (computed in the wrapper), then ReLU.
    a = jnp.maximum(h_ref[...] * sc_ref[...] + sh_ref[...], 0.0)
    h = jnp.dot(a.astype(w_ref.dtype), w_ref[...], preferred_element_type=jnp.float32) + b_ref[...]
    hout_ref[...] = h
    _tile_partial_stats(h, psum_ref, psq_ref, e_valid, needs_mask)


def _bn_relu_linear_kernel(h_ref, sc_ref, sh_ref, w_ref, b_ref, out_ref):
    a = jnp.maximum(h_ref[...] * sc_ref[...] + sh_ref[...], 0.0)
    out_ref[...] = (jnp.dot(a.astype(w_ref.dtype), w_ref[...],
                            preferred_element_type=jnp.float32) + b_ref[...]).astype(out_ref.dtype)


# ----------------------------- wrapper -----------------------------

def _bn_affine(psum, psq, gamma_p, beta_p, n):
    """Cross-tile reduce of partial stats -> folded BN (scale, shift). Tiny XLA ops."""
    s1 = psum.sum(axis=(0, 1))                      # (Hp,)
    s2 = psq.sum(axis=(0, 1))                       # (Hp,)
    mean = s1 / n
    var = jnp.maximum(s2 / n - mean * mean, 0.0)    # biased variance (training-mode BN)
    inv = jax.lax.rsqrt(var + BN_EPS)
    scale = gamma_p[0] * inv
    shift = beta_p[0] - mean * scale
    return scale[None, :], shift[None, :]


def edge_model_forward(src, dest, edge_attr, u, batch, params, *,
                       tile_e=512, compute_dtype=jnp.float32):
    """EdgeModel.forward — `u` and `batch` are unused by the reference module."""
    del u, batch
    w0, b0, g0, be0, w1, b1, g1, be1, w2, b2 = params

    E, Fn = src.shape
    Fd = dest.shape[1]
    Fe = edge_attr.shape[1]
    H = w0.shape[1]
    O = w2.shape[1]

    Hp = _round_up(H, LANE)                 # lane-dense hidden width
    Op = _round_up(O, LANE)                 # lane-dense output width (sliced at the end)
    TE = _round_up(min(tile_e, E), SUB)     # E-tile (multiple of 8)
    Ep = _round_up(E, TE)
    nt = Ep // TE
    needs_mask = (Ep != E)
    cd = compute_dtype

    # ---- pad / split parameters in the wrapper (zero padding keeps the math exact) ----
    w0a = _pad2(w0[:Fn], Fn, Hp).astype(cd)
    w0b = _pad2(w0[Fn:Fn + Fd], Fd, Hp).astype(cd)
    w0c = _pad2(w0[Fn + Fd:], Fe, Hp).astype(cd)
    b0p = _pad2(b0, 1, Hp)
    g0p, be0p = _pad2(g0, 1, Hp), _pad2(be0, 1, Hp)
    w1p, b1p = _pad2(w1, Hp, Hp).astype(cd), _pad2(b1, 1, Hp)
    g1p, be1p = _pad2(g1, 1, Hp), _pad2(be1, 1, Hp)
    w2p, b2p = _pad2(w2, Hp, Op).astype(cd), _pad2(b2, 1, Op)

    srcp = _pad_rows(src, Ep).astype(cd)
    dstp = _pad_rows(dest, Ep).astype(cd)
    eap = _pad_rows(edge_attr, Ep).astype(cd)

    cparams = pltpu.CompilerParams(
        dimension_semantics=("parallel",),       # independent E-tiles -> pipelined / megacore
        vmem_limit_bytes=32 * 1024 * 1024)       # TE sized well under this on all generations

    row = lambda f: pl.BlockSpec((TE, f), lambda i: (i, 0))          # E-blocked operands
    full = lambda a: pl.BlockSpec(a.shape, lambda i: (0,) * a.ndim)  # VMEM-resident params
    stat_spec = pl.BlockSpec((1, SUB, Hp), lambda i: (i, 0, 0))
    stat_shape = jax.ShapeDtypeStruct((nt, SUB, Hp), jnp.float32)

    # ---- pass A: split Linear0 + partial BN stats of h0 ----
    h0, s0, q0 = pl.pallas_call(
        functools.partial(_linear0_stats_kernel, e_valid=E, needs_mask=needs_mask),
        grid=(nt,),
        in_specs=[row(Fn), row(Fd), row(Fe),
                  full(w0a), full(w0b), full(w0c), full(b0p)],
        out_specs=(pl.BlockSpec((TE, Hp), lambda i: (i, 0)), stat_spec, stat_spec),
        out_shape=(jax.ShapeDtypeStruct((Ep, Hp), jnp.float32), stat_shape, stat_shape),
        compiler_params=cparams,
        cost_estimate=pl.CostEstimate(flops=int(2 * Ep * (Fn + Fd + Fe) * Hp),
                                      transcendentals=0,
                                      bytes_accessed=int(4 * Ep * (Fn + Fd + Fe + Hp))),
    )(srcp, dstp, eap, w0a, w0b, w0c, b0p)

    sc0, sh0 = _bn_affine(s0, q0, g0p, be0p, E)

    # ---- pass B: BN0 apply + ReLU + Linear1 + partial BN stats of h1 ----
    h1, s1, q1 = pl.pallas_call(
        functools.partial(_bn_relu_linear_stats_kernel, e_valid=E, needs_mask=needs_mask),
        grid=(nt,),
        in_specs=[pl.BlockSpec((TE, Hp), lambda i: (i, 0)),
                  full(sc0), full(sh0), full(w1p), full(b1p)],
        out_specs=(pl.BlockSpec((TE, Hp), lambda i: (i, 0)), stat_spec, stat_spec),
        out_shape=(jax.ShapeDtypeStruct((Ep, Hp), jnp.float32), stat_shape, stat_shape),
        compiler_params=cparams,
        cost_estimate=pl.CostEstimate(flops=int(2 * Ep * Hp * Hp), transcendentals=0,
                                      bytes_accessed=int(4 * Ep * 2 * Hp)),
    )(h0, sc0, sh0, w1p, b1p)

    sc1, sh1 = _bn_affine(s1, q1, g1p, be1p, E)

    # ---- pass C: BN1 apply + ReLU + Linear2 (plain last layer) ----
    outp = pl.pallas_call(
        _bn_relu_linear_kernel,
        grid=(nt,),
        in_specs=[pl.BlockSpec((TE, Hp), lambda i: (i, 0)),
                  full(sc1), full(sh1), full(w2p), full(b2p)],
        out_specs=pl.BlockSpec((TE, Op), lambda i: (i, 0)),
        out_shape=jax.ShapeDtypeStruct((Ep, Op), jnp.float32),
        compiler_params=cparams,
        cost_estimate=pl.CostEstimate(flops=int(2 * Ep * Hp * Op), transcendentals=0,
                                      bytes_accessed=int(4 * Ep * (Hp + Op))),
    )(h1, sc1, sh1, w2p, b2p)

    return outp[:E, :O]


# ---------------- parameter init (deterministic, mirrors module __init__) ----------------

def xavier_uniform(key, fan_in, fan_out):
    bound = (6.0 / (fan_in + fan_out)) ** 0.5
    return jax.random.uniform(key, (fan_in, fan_out), jnp.float32, -bound, bound)


def init_params(key, in_dim, hidden_dim, out_dim):
    k0, k1, k2 = jax.random.split(key, 3)
    w0 = xavier_uniform(k0, in_dim, hidden_dim)
    b0 = jnp.full((1, hidden_dim), 0.01, jnp.float32)
    g0 = jnp.ones((1, hidden_dim), jnp.float32)
    be0 = jnp.zeros((1, hidden_dim), jnp.float32)
    w1 = xavier_uniform(k1, hidden_dim, hidden_dim)
    b1 = jnp.full((1, hidden_dim), 0.01, jnp.float32)
    g1 = jnp.ones((1, hidden_dim), jnp.float32)
    be1 = jnp.zeros((1, hidden_dim), jnp.float32)
    w2 = xavier_uniform(k2, hidden_dim, out_dim)
    b2 = jnp.full((1, out_dim), 0.01, jnp.float32)
    return (w0, b0, g0, be0, w1, b1, g1, be1, w2, b2)


# ---------------- pure-JAX reference for correctness ----------------

def ref_forward(src, dest, edge_attr, params):
    (w0, b0, g0, be0, w1, b1, g1, be1, w2, b2) = params
    x = jnp.concatenate([src, dest, edge_attr], axis=1)

    def layer(h, w, b, g, be):
        h = h @ w + b
        m = h.mean(0, keepdims=True)
        v = ((h - m) ** 2).mean(0, keepdims=True)
        h = (h - m) / jnp.sqrt(v + BN_EPS) * g + be
        return jnp.maximum(h, 0.0)

    h = layer(x, w0, b0, g0, be0)
    h = layer(h, w1, b1, g1, be1)
    return h @ w2 + b2


if __name__ == "__main__":
    key = jax.random.PRNGKey(0)
    E, node_dim, edge_dim, hidden_dim = 1000, 32, 32, 64
    in_dim = 2 * node_dim + edge_dim  # 96

    ks = jax.random.split(key, 5)
    src = jax.random.normal(ks[0], (E, node_dim), jnp.float32)
    dest = jax.random.normal(ks[1], (E, node_dim), jnp.float32)
    edge_attr = jax.random.normal(ks[2], (E, edge_dim), jnp.float32)
    u = jax.random.normal(ks[3], (2, 16), jnp.float32)   # global features (unused by EdgeModel)
    batch = jnp.zeros((E,), jnp.int32)                   # batch vector (unused by EdgeModel)

    params = init_params(ks[4], in_dim, hidden_dim, edge_dim)

    # TE=256 with E=1000 exercises multiple tiles plus a masked partial last tile.
    fwd = jax.jit(functools.partial(edge_model_forward, tile_e=256))
    out = jax.block_until_ready(fwd(src, dest, edge_attr, u, batch, params))

    ref = ref_forward(src, dest, edge_attr, params)
    assert out.shape == (E, edge_dim)
    assert bool(jnp.allclose(out, ref, atol=1e-3, rtol=1e-3)), "mismatch vs reference"
    print("KERNEL_OK")
</pallas_src>

<mosaic_0001>
module attributes {stable_mosaic.version = 11 : i64} {
  func.func @_bn_relu_linear_stats_kernel(%arg0: i32, %arg1: memref<256x128xf32, #tpu.memory_space<vmem>>, %arg2: memref<1x128xf32, #tpu.memory_space<vmem>>, %arg3: memref<1x128xf32, #tpu.memory_space<vmem>>, %arg4: memref<128x128xf32, #tpu.memory_space<vmem>>, %arg5: memref<1x128xf32, #tpu.memory_space<vmem>>, %arg6: memref<256x128xf32, #tpu.memory_space<vmem>>, %arg7: memref<1x8x128xf32, #tpu.memory_space<vmem>>, %arg8: memref<1x8x128xf32, #tpu.memory_space<vmem>>) attributes {dimension_semantics = [#tpu.dimension_semantics<parallel>], iteration_bounds = array<i64: 4>, scalar_prefetch = 0 : i64, scratch_operands = 0 : i64, tpu.core_type = #tpu.core_type<tc>, window_params = [{transform_indices = @transform_0, window_bounds = array<i64: 256, 128>}, {pipeline_mode = #tpu.pipeline_mode<synchronous>, transform_indices = @transform_1, window_bounds = array<i64: 1, 128>}, {pipeline_mode = #tpu.pipeline_mode<synchronous>, transform_indices = @transform_2, window_bounds = array<i64: 1, 128>}, {pipeline_mode = #tpu.pipeline_mode<synchronous>, transform_indices = @transform_3, window_bounds = array<i64: 128, 128>}, {pipeline_mode = #tpu.pipeline_mode<synchronous>, transform_indices = @transform_4, window_bounds = array<i64: 1, 128>}, {transform_indices = @transform_5, window_bounds = array<i64: 256, 128>}, {transform_indices = @transform_6, window_bounds = array<i64: 1, 8, 128>}, {transform_indices = @transform_7, window_bounds = array<i64: 1, 8, 128>}]} {
    %c0 = arith.constant 0 : index
    %c0_0 = arith.constant 0 : index
    %0 = vector.load %arg1[%c0, %c0_0] : memref<256x128xf32, #tpu.memory_space<vmem>>, vector<256x128xf32>
    %c0_1 = arith.constant 0 : index
    %c0_2 = arith.constant 0 : index
    %1 = vector.load %arg2[%c0_1, %c0_2] : memref<1x128xf32, #tpu.memory_space<vmem>>, vector<1x128xf32>
    %2 = vector.broadcast %1 : vector<1x128xf32> to vector<256x128xf32>
    %3 = arith.mulf %0, %2 : vector<256x128xf32>
    %c0_3 = arith.constant 0 : index
    %c0_4 = arith.constant 0 : index
    %4 = vector.load %arg3[%c0_3, %c0_4] : memref<1x128xf32, #tpu.memory_space<vmem>>, vector<1x128xf32>
    %5 = vector.broadcast %4 : vector<1x128xf32> to vector<256x128xf32>
    %6 = arith.addf %3, %5 : vector<256x128xf32>
    %cst = arith.constant 0.000000e+00 : f32
    %7 = vector.broadcast %cst : f32 to vector<256x128xf32>
    %8 = arith.maximumf %6, %7 : vector<256x128xf32>
    %c0_5 = arith.constant 0 : index
    %c0_6 = arith.constant 0 : index
    %9 = vector.load %arg4[%c0_5, %c0_6] : memref<128x128xf32, #tpu.memory_space<vmem>>, vector<128x128xf32>
    %cst_7 = arith.constant dense<0.000000e+00> : vector<256x128xf32>
    %10 = tpu.matmul %8, %9, %cst_7 {dimension_numbers = #tpu.dot_dimension_numbers<[1], [0], [0], [1], [0, 0, 1, 1], [], []>} : vector<256x128xf32>, vector<128x128xf32>, vector<256x128xf32> -> vector<256x128xf32>
    %c0_8 = arith.constant 0 : index
    %c0_9 = arith.constant 0 : index
    %11 = vector.load %arg5[%c0_8, %c0_9] : memref<1x128xf32, #tpu.memory_space<vmem>>, vector<1x128xf32>
    %12 = vector.broadcast %11 : vector<1x128xf32> to vector<256x128xf32>
    %13 = arith.addf %10, %12 : vector<256x128xf32>
    %c0_10 = arith.constant 0 : index
    %c0_11 = arith.constant 0 : index
    %14 = vector.load %arg6[%c0_10, %c0_11] : memref<256x128xf32, #tpu.memory_space<vmem>>, vector<256x128xf32>
    tpu.vector_store %arg6[%c0_10, %c0_11], %13 {strides = array<i32>} : memref<256x128xf32, #tpu.memory_space<vmem>>, vector<256x128xf32>,
    %c256_i32 = arith.constant 256 : i32
    %15 = arith.muli %arg0, %c256_i32 : i32
    %16 = tpu.iota {dimensions = array<i32: 0>} : vector<256x1xi32>
    %17 = vector.broadcast %15 : i32 to vector<256x1xi32>
    %18 = arith.addi %17, %16 : vector<256x1xi32>
    %c1000_i32 = arith.constant 1000 : i32
    %19 = vector.broadcast %c1000_i32 : i32 to vector<256x1xi32>
    %20 = arith.cmpi slt, %18, %19 : vector<256x1xi32>
    %21 = arith.extui %20 : vector<256x1xi1> to vector<256x1xi32>
    %22 = arith.sitofp %21 : vector<256x1xi32> to vector<256x1xf32>
    %23 = vector.broadcast %22 : vector<256x1xf32> to vector<256x128xf32>
    %24 = arith.mulf %13, %23 : vector<256x128xf32>
    %25 = vector.shape_cast %24 : vector<256x128xf32> to vector<32x8x128xf32>
    %cst_12 = arith.constant dense<0.000000e+00> : vector<8x128xf32>
    %26 = vector.multi_reduction <add>, %25, %cst_12 [0] : vector<32x8x128xf32> to vector<8x128xf32>
    %c0_13 = arith.constant 0 : index
    %c0_14 = arith.constant 0 : index
    %c0_15 = arith.constant 0 : index
    %27 = vector.load %arg7[%c0_13, %c0_14, %c0_15] : memref<1x8x128xf32, #tpu.memory_space<vmem>>, vector<1x8x128xf32>
    %28 = vector.shape_cast %27 : vector<1x8x128xf32> to vector<8x128xf32>
    %29 = vector.shape_cast %26 : vector<8x128xf32> to vector<1x8x128xf32>
    tpu.vector_store %arg7[%c0_13, %c0_14, %c0_15], %29 {strides = array<i32>} : memref<1x8x128xf32, #tpu.memory_space<vmem>>, vector<1x8x128xf32>,
    %30 = arith.mulf %24, %13 : vector<256x128xf32>
    %31 = vector.shape_cast %30 : vector<256x128xf32> to vector<32x8x128xf32>
    %cst_16 = arith.constant dense<0.000000e+00> : vector<8x128xf32>
    %32 = vector.multi_reduction <add>, %31, %cst_16 [0] : vector<32x8x128xf32> to vector<8x128xf32>
    %c0_17 = arith.constant 0 : index
    %c0_18 = arith.constant 0 : index
    %c0_19 = arith.constant 0 : index
    %33 = vector.load %arg8[%c0_17, %c0_18, %c0_19] : memref<1x8x128xf32, #tpu.memory_space<vmem>>, vector<1x8x128xf32>
    %34 = vector.shape_cast %33 : vector<1x8x128xf32> to vector<8x128xf32>
    %35 = vector.shape_cast %32 : vector<8x128xf32> to vector<1x8x128xf32>
    tpu.vector_store %arg8[%c0_17, %c0_18, %c0_19], %35 {strides = array<i32>} : memref<1x8x128xf32, #tpu.memory_space<vmem>>, vector<1x8x128xf32>,
    return
  }
  func.func @transform_0(%arg0: i32) -> (i32, i32) {
    %c0_i32 = arith.constant 0 : i32
    %c0_i32_0 = arith.constant 0 : i32
    return %arg0, %c0_i32 : i32, i32
  }
  func.func @transform_1(%arg0: i32) -> (i32, i32) {
    %c0_i32 = arith.constant 0 : i32
    %c0_i32_0 = arith.constant 0 : i32
    %c0_i32_1 = arith.constant 0 : i32
    return %c0_i32, %c0_i32_0 : i32, i32
  }
  func.func @transform_2(%arg0: i32) -> (i32, i32) {
    %c0_i32 = arith.constant 0 : i32
    %c0_i32_0 = arith.constant 0 : i32
    %c0_i32_1 = arith.constant 0 : i32
    return %c0_i32, %c0_i32_0 : i32, i32
  }
  func.func @transform_3(%arg0: i32) -> (i32, i32) {
    %c0_i32 = arith.constant 0 : i32
    %c0_i32_0 = arith.constant 0 : i32
    %c0_i32_1 = arith.constant 0 : i32
    return %c0_i32, %c0_i32_0 : i32, i32
  }
  func.func @transform_4(%arg0: i32) -> (i32, i32) {
    %c0_i32 = arith.constant 0 : i32
    %c0_i32_0 = arith.constant 0 : i32
    %c0_i32_1 = arith.constant 0 : i32
    return %c0_i32, %c0_i32_0 : i32, i32
  }
  func.func @transform_5(%arg0: i32) -> (i32, i32) {
    %c0_i32 = arith.constant 0 : i32
    %c0_i32_0 = arith.constant 0 : i32
    return %arg0, %c0_i32 : i32, i32
  }
  func.func @transform_6(%arg0: i32) -> (i32, i32, i32) {
    %c0_i32 = arith.constant 0 : i32
    %c0_i32_0 = arith.constant 0 : i32
    %c0_i32_1 = arith.constant 0 : i32
    return %arg0, %c0_i32, %c0_i32_0 : i32, i32, i32
  }
  func.func @transform_7(%arg0: i32) -> (i32, i32, i32) {
    %c0_i32 = arith.constant 0 : i32
    %c0_i32_0 = arith.constant 0 : i32
    %c0_i32_1 = arith.constant 0 : i32
    return %arg0, %c0_i32, %c0_i32_0 : i32, i32, i32
  }
}

module attributes {stable_mosaic.version = 11 : i64} {
  func.func @_linear0_stats_kernel(%arg0: i32, %arg1: memref<256x32xf32, #tpu.memory_space<vmem>>, %arg2: memref<256x32xf32, #tpu.memory_space<vmem>>, %arg3: memref<256x32xf32, #tpu.memory_space<vmem>>, %arg4: memref<32x128xf32, #tpu.memory_space<vmem>>, %arg5: memref<32x128xf32, #tpu.memory_space<vmem>>, %arg6: memref<32x128xf32, #tpu.memory_space<vmem>>, %arg7: memref<1x128xf32, #tpu.memory_space<vmem>>, %arg8: memref<256x128xf32, #tpu.memory_space<vmem>>, %arg9: memref<1x8x128xf32, #tpu.memory_space<vmem>>, %arg10: memref<1x8x128xf32, #tpu.memory_space<vmem>>) attributes {dimension_semantics = [#tpu.dimension_semantics<parallel>], iteration_bounds = array<i64: 4>, scalar_prefetch = 0 : i64, scratch_operands = 0 : i64, tpu.core_type = #tpu.core_type<tc>, window_params = [{transform_indices = @transform_0, window_bounds = array<i64: 256, 32>}, {transform_indices = @transform_1, window_bounds = array<i64: 256, 32>}, {transform_indices = @transform_2, window_bounds = array<i64: 256, 32>}, {pipeline_mode = #tpu.pipeline_mode<synchronous>, transform_indices = @transform_3, window_bounds = array<i64: 32, 128>}, {pipeline_mode = #tpu.pipeline_mode<synchronous>, transform_indices = @transform_4, window_bounds = array<i64: 32, 128>}, {pipeline_mode = #tpu.pipeline_mode<synchronous>, transform_indices = @transform_5, window_bounds = array<i64: 32, 128>}, {pipeline_mode = #tpu.pipeline_mode<synchronous>, transform_indices = @transform_6, window_bounds = array<i64: 1, 128>}, {transform_indices = @transform_7, window_bounds = array<i64: 256, 128>}, {transform_indices = @transform_8, window_bounds = array<i64: 1, 8, 128>}, {transform_indices = @transform_9, window_bounds = array<i64: 1, 8, 128>}]} {
    %c0 = arith.constant 0 : index
    %c0_0 = arith.constant 0 : index
    %0 = vector.load %arg1[%c0, %c0_0] : memref<256x32xf32, #tpu.memory_space<vmem>>, vector<256x32xf32>
    %c0_1 = arith.constant 0 : index
    %c0_2 = arith.constant 0 : index
    %1 = vector.load %arg4[%c0_1, %c0_2] : memref<32x128xf32, #tpu.memory_space<vmem>>, vector<32x128xf32>
    %cst = arith.constant dense<0.000000e+00> : vector<256x128xf32>
    %2 = tpu.matmul %0, %1, %cst {dimension_numbers = #tpu.dot_dimension_numbers<[1], [0], [0], [1], [0, 0, 1, 1], [], []>} : vector<256x32xf32>, vector<32x128xf32>, vector<256x128xf32> -> vector<256x128xf32>
    %c0_3 = arith.constant 0 : index
    %c0_4 = arith.constant 0 : index
    %3 = vector.load %arg2[%c0_3, %c0_4] : memref<256x32xf32, #tpu.memory_space<vmem>>, vector<256x32xf32>
    %c0_5 = arith.constant 0 : index
    %c0_6 = arith.constant 0 : index
    %4 = vector.load %arg5[%c0_5, %c0_6] : memref<32x128xf32, #tpu.memory_space<vmem>>, vector<32x128xf32>
    %cst_7 = arith.constant dense<0.000000e+00> : vector<256x128xf32>
    %5 = tpu.matmul %3, %4, %cst_7 {dimension_numbers = #tpu.dot_dimension_numbers<[1], [0], [0], [1], [0, 0, 1, 1], [], []>} : vector<256x32xf32>, vector<32x128xf32>, vector<256x128xf32> -> vector<256x128xf32>
    %6 = arith.addf %2, %5 : vector<256x128xf32>
    %c0_8 = arith.constant 0 : index
    %c0_9 = arith.constant 0 : index
    %7 = vector.load %arg3[%c0_8, %c0_9] : memref<256x32xf32, #tpu.memory_space<vmem>>, vector<256x32xf32>
    %c0_10 = arith.constant 0 : index
    %c0_11 = arith.constant 0 : index
    %8 = vector.load %arg6[%c0_10, %c0_11] : memref<32x128xf32, #tpu.memory_space<vmem>>, vector<32x128xf32>
    %cst_12 = arith.constant dense<0.000000e+00> : vector<256x128xf32>
    %9 = tpu.matmul %7, %8, %cst_12 {dimension_numbers = #tpu.dot_dimension_numbers<[1], [0], [0], [1], [0, 0, 1, 1], [], []>} : vector<256x32xf32>, vector<32x128xf32>, vector<256x128xf32> -> vector<256x128xf32>
    %10 = arith.addf %6, %9 : vector<256x128xf32>
    %c0_13 = arith.constant 0 : index
    %c0_14 = arith.constant 0 : index
    %11 = vector.load %arg7[%c0_13, %c0_14] : memref<1x128xf32, #tpu.memory_space<vmem>>, vector<1x128xf32>
    %12 = vector.broadcast %11 : vector<1x128xf32> to vector<256x128xf32>
    %13 = arith.addf %10, %12 : vector<256x128xf32>
    %c0_15 = arith.constant 0 : index
    %c0_16 = arith.constant 0 : index
    %14 = vector.load %arg8[%c0_15, %c0_16] : memref<256x128xf32, #tpu.memory_space<vmem>>, vector<256x128xf32>
    tpu.vector_store %arg8[%c0_15, %c0_16], %13 {strides = array<i32>} : memref<256x128xf32, #tpu.memory_space<vmem>>, vector<256x128xf32>,
    %c256_i32 = arith.constant 256 : i32
    %15 = arith.muli %arg0, %c256_i32 : i32
    %16 = tpu.iota {dimensions = array<i32: 0>} : vector<256x1xi32>
    %17 = vector.broadcast %15 : i32 to vector<256x1xi32>
    %18 = arith.addi %17, %16 : vector<256x1xi32>
    %c1000_i32 = arith.constant 1000 : i32
    %19 = vector.broadcast %c1000_i32 : i32 to vector<256x1xi32>
    %20 = arith.cmpi slt, %18, %19 : vector<256x1xi32>
    %21 = arith.extui %20 : vector<256x1xi1> to vector<256x1xi32>
    %22 = arith.sitofp %21 : vector<256x1xi32> to vector<256x1xf32>
    %23 = vector.broadcast %22 : vector<256x1xf32> to vector<256x128xf32>
    %24 = arith.mulf %13, %23 : vector<256x128xf32>
    %25 = vector.shape_cast %24 : vector<256x128xf32> to vector<32x8x128xf32>
    %cst_17 = arith.constant dense<0.000000e+00> : vector<8x128xf32>
    %26 = vector.multi_reduction <add>, %25, %cst_17 [0] : vector<32x8x128xf32> to vector<8x128xf32>
    %c0_18 = arith.constant 0 : index
    %c0_19 = arith.constant 0 : index
    %c0_20 = arith.constant 0 : index
    %27 = vector.load %arg9[%c0_18, %c0_19, %c0_20] : memref<1x8x128xf32, #tpu.memory_space<vmem>>, vector<1x8x128xf32>
    %28 = vector.shape_cast %27 : vector<1x8x128xf32> to vector<8x128xf32>
    %29 = vector.shape_cast %26 : vector<8x128xf32> to vector<1x8x128xf32>
    tpu.vector_store %arg9[%c0_18, %c0_19, %c0_20], %29 {strides = array<i32>} : memref<1x8x128xf32, #tpu.memory_space<vmem>>, vector<1x8x128xf32>,
    %30 = arith.mulf %24, %13 : vector<256x128xf32>
    %31 = vector.shape_cast %30 : vector<256x128xf32> to vector<32x8x128xf32>
    %cst_21 = arith.constant dense<0.000000e+00> : vector<8x128xf32>
    %32 = vector.multi_reduction <add>, %31, %cst_21 [0] : vector<32x8x128xf32> to vector<8x128xf32>
    %c0_22 = arith.constant 0 : index
    %c0_23 = arith.constant 0 : index
    %c0_24 = arith.constant 0 : index
    %33 = vector.load %arg10[%c0_22, %c0_23, %c0_24] : memref<1x8x128xf32, #tpu.memory_space<vmem>>, vector<1x8x128xf32>
    %34 = vector.shape_cast %33 : vector<1x8x128xf32> to vector<8x128xf32>
    %35 = vector.shape_cast %32 : vector<8x128xf32> to vector<1x8x128xf32>
    tpu.vector_store %arg10[%c0_22, %c0_23, %c0_24], %35 {strides = array<i32>} : memref<1x8x128xf32, #tpu.memory_space<vmem>>, vector<1x8x128xf32>,
    return
  }
  func.func @transform_0(%arg0: i32) -> (i32, i32) {
    %c0_i32 = arith.constant 0 : i32
    %c0_i32_0 = arith.constant 0 : i32
    return %arg0, %c0_i32 : i32, i32
  }
  func.func @transform_1(%arg0: i32) -> (i32, i32) {
    %c0_i32 = arith.constant 0 : i32
    %c0_i32_0 = arith.constant 0 : i32
    return %arg0, %c0_i32 : i32, i32
  }
  func.func @transform_2(%arg0: i32) -> (i32, i32) {
    %c0_i32 = arith.constant 0 : i32
    %c0_i32_0 = arith.constant 0 : i32
    return %arg0, %c0_i32 : i32, i32
  }
  func.func @transform_3(%arg0: i32) -> (i32, i32) {
    %c0_i32 = arith.constant 0 : i32
    %c0_i32_0 = arith.constant 0 : i32
    %c0_i32_1 = arith.constant 0 : i32
    return %c0_i32, %c0_i32_0 : i32, i32
  }
  func.func @transform_4(%arg0: i32) -> (i32, i32) {
    %c0_i32 = arith.constant 0 : i32
    %c0_i32_0 = arith.constant 0 : i32
    %c0_i32_1 = arith.constant 0 : i32
    return %c0_i32, %c0_i32_0 : i32, i32
  }
  func.func @transform_5(%arg0: i32) -> (i32, i32) {
    %c0_i32 = arith.constant 0 : i32
    %c0_i32_0 = arith.constant 0 : i32
    %c0_i32_1 = arith.constant 0 : i32
    return %c0_i32, %c0_i32_0 : i32, i32
  }
  func.func @transform_6(%arg0: i32) -> (i32, i32) {
    %c0_i32 = arith.constant 0 : i32
    %c0_i32_0 = arith.constant 0 : i32
    %c0_i32_1 = arith.constant 0 : i32
    return %c0_i32, %c0_i32_0 : i32, i32
  }
  func.func @transform_7(%arg0: i32) -> (i32, i32) {
    %c0_i32 = arith.constant 0 : i32
    %c0_i32_0 = arith.constant 0 : i32
    return %arg0, %c0_i32 : i32, i32
  }
  func.func @transform_8(%arg0: i32) -> (i32, i32, i32) {
    %c0_i32 = arith.constant 0 : i32
    %c0_i32_0 = arith.constant 0 : i32
    %c0_i32_1 = arith.constant 0 : i32
    return %arg0, %c0_i32, %c0_i32_0 : i32, i32, i32
  }
  func.func @transform_9(%arg0: i32) -> (i32, i32, i32) {
    %c0_i32 = arith.constant 0 : i32
    %c0_i32_0 = arith.constant 0 : i32
    %c0_i32_1 = arith.constant 0 : i32
    return %arg0, %c0_i32, %c0_i32_0 : i32, i32, i32
  }
}

module attributes {stable_mosaic.version = 11 : i64} {
  func.func @_bn_relu_linear_kernel(%arg0: i32, %arg1: memref<256x128xf32, #tpu.memory_space<vmem>>, %arg2: memref<1x128xf32, #tpu.memory_space<vmem>>, %arg3: memref<1x128xf32, #tpu.memory_space<vmem>>, %arg4: memref<128x128xf32, #tpu.memory_space<vmem>>, %arg5: memref<1x128xf32, #tpu.memory_space<vmem>>, %arg6: memref<256x128xf32, #tpu.memory_space<vmem>>) attributes {dimension_semantics = [#tpu.dimension_semantics<parallel>], iteration_bounds = array<i64: 4>, scalar_prefetch = 0 : i64, scratch_operands = 0 : i64, tpu.core_type = #tpu.core_type<tc>, window_params = [{transform_indices = @transform_0, window_bounds = array<i64: 256, 128>}, {pipeline_mode = #tpu.pipeline_mode<synchronous>, transform_indices = @transform_1, window_bounds = array<i64: 1, 128>}, {pipeline_mode = #tpu.pipeline_mode<synchronous>, transform_indices = @transform_2, window_bounds = array<i64: 1, 128>}, {pipeline_mode = #tpu.pipeline_mode<synchronous>, transform_indices = @transform_3, window_bounds = array<i64: 128, 128>}, {pipeline_mode = #tpu.pipeline_mode<synchronous>, transform_indices = @transform_4, window_bounds = array<i64: 1, 128>}, {transform_indices = @transform_5, window_bounds = array<i64: 256, 128>}]} {
    %c0 = arith.constant 0 : index
    %c0_0 = arith.constant 0 : index
    %0 = vector.load %arg1[%c0, %c0_0] : memref<256x128xf32, #tpu.memory_space<vmem>>, vector<256x128xf32>
    %c0_1 = arith.constant 0 : index
    %c0_2 = arith.constant 0 : index
    %1 = vector.load %arg2[%c0_1, %c0_2] : memref<1x128xf32, #tpu.memory_space<vmem>>, vector<1x128xf32>
    %2 = vector.broadcast %1 : vector<1x128xf32> to vector<256x128xf32>
    %3 = arith.mulf %0, %2 : vector<256x128xf32>
    %c0_3 = arith.constant 0 : index
    %c0_4 = arith.constant 0 : index
    %4 = vector.load %arg3[%c0_3, %c0_4] : memref<1x128xf32, #tpu.memory_space<vmem>>, vector<1x128xf32>
    %5 = vector.broadcast %4 : vector<1x128xf32> to vector<256x128xf32>
    %6 = arith.addf %3, %5 : vector<256x128xf32>
    %cst = arith.constant 0.000000e+00 : f32
    %7 = vector.broadcast %cst : f32 to vector<256x128xf32>
    %8 = arith.maximumf %6, %7 : vector<256x128xf32>
    %c0_5 = arith.constant 0 : index
    %c0_6 = arith.constant 0 : index
    %9 = vector.load %arg4[%c0_5, %c0_6] : memref<128x128xf32, #tpu.memory_space<vmem>>, vector<128x128xf32>
    %cst_7 = arith.constant dense<0.000000e+00> : vector<256x128xf32>
    %10 = tpu.matmul %8, %9, %cst_7 {dimension_numbers = #tpu.dot_dimension_numbers<[1], [0], [0], [1], [0, 0, 1, 1], [], []>} : vector<256x128xf32>, vector<128x128xf32>, vector<256x128xf32> -> vector<256x128xf32>
    %c0_8 = arith.constant 0 : index
    %c0_9 = arith.constant 0 : index
    %11 = vector.load %arg5[%c0_8, %c0_9] : memref<1x128xf32, #tpu.memory_space<vmem>>, vector<1x128xf32>
    %12 = vector.broadcast %11 : vector<1x128xf32> to vector<256x128xf32>
    %13 = arith.addf %10, %12 : vector<256x128xf32>
    %c0_10 = arith.constant 0 : index
    %c0_11 = arith.constant 0 : index
    %14 = vector.load %arg6[%c0_10, %c0_11] : memref<256x128xf32, #tpu.memory_space<vmem>>, vector<256x128xf32>
    tpu.vector_store %arg6[%c0_10, %c0_11], %13 {strides = array<i32>} : memref<256x128xf32, #tpu.memory_space<vmem>>, vector<256x128xf32>,
    return
  }
  func.func @transform_0(%arg0: i32) -> (i32, i32) {
    %c0_i32 = arith.constant 0 : i32
    %c0_i32_0 = arith.constant 0 : i32
    return %arg0, %c0_i32 : i32, i32
  }
  func.func @transform_1(%arg0: i32) -> (i32, i32) {
    %c0_i32 = arith.constant 0 : i32
    %c0_i32_0 = arith.constant 0 : i32
    %c0_i32_1 = arith.constant 0 : i32
    return %c0_i32, %c0_i32_0 : i32, i32
  }
  func.func @transform_2(%arg0: i32) -> (i32, i32) {
    %c0_i32 = arith.constant 0 : i32
    %c0_i32_0 = arith.constant 0 : i32
    %c0_i32_1 = arith.constant 0 : i32
    return %c0_i32, %c0_i32_0 : i32, i32
  }
  func.func @transform_3(%arg0: i32) -> (i32, i32) {
    %c0_i32 = arith.constant 0 : i32
    %c0_i32_0 = arith.constant 0 : i32
    %c0_i32_1 = arith.constant 0 : i32
    return %c0_i32, %c0_i32_0 : i32, i32
  }
  func.func @transform_4(%arg0: i32) -> (i32, i32) {
    %c0_i32 = arith.constant 0 : i32
    %c0_i32_0 = arith.constant 0 : i32
    %c0_i32_1 = arith.constant 0 : i32
    return %c0_i32, %c0_i32_0 : i32, i32
  }
  func.func @transform_5(%arg0: i32) -> (i32, i32) {
    %c0_i32 = arith.constant 0 : i32
    %c0_i32_0 = arith.constant 0 : i32
    return %arg0, %c0_i32 : i32, i32
  }
}

</mosaic_0001>

<bundles_post_ra>
// kernel: edge_model_forward.5
= control target key start
LH: loop header
LB: loop body
LE: loop exit
PB: predicated region body
PF: predicated region fallthrough
CT: control target
= control target key end

     0   :  { %s942_s18 = smov 0   ;;  %s1193_s0 = inlined_call_operand.vmem [shape: f32[1024,128], index: 0, kind: input, shape index: {}]   ;;  %s1194_s1 = inlined_call_operand.vmem [shape: f32[1,128], index: 1, kind: input, shape index: {}]   ;;  %s1195_s2 = inlined_call_operand.vmem [shape: f32[1,128], index: 2, kind: input, shape index: {}]   ;;  %s1196_s3 = inlined_call_operand.vmem [shape: f32[128,128], index: 3, kind: input, shape index: {}]   ;;  %s1197_s4 = inlined_call_operand.vmem [shape: f32[1,128], index: 4, kind: input, shape index: {}]   ;;  %s1198_s5 = inlined_call_operand.vmem [shape: f32[1024,128], index: 5, kind: output, shape index: {}]  }
   0x1 LB: > { %s706_s19 = sadd.s32 4294967295, %s910_s18   ;;  %p710_p0 = scmp.ge.s32.totalorder %s910_s18, 1  ;;  %s910_s18 = sphi %s942_s18, %s15_s18  }
   0x2   : > { %p188_p1 = scmp.lt.s32.totalorder %s910_s18, 5 }
   0x4   : > { %p189_p2 = pnand %p710_p0, %p188_p1 }
   0x5   : > { %v370_v0 = vld [vmem:[%s1196_s3] sm:$0xff] (!%p189_p2)  ;;  %v371_v1 = vld [vmem:[%s1196_s3 + $0x8] sm:$0xff] (!%p189_p2)  ;;  %v372_v2 = vld [vmem:[%s1196_s3 + $0x10] sm:$0xff] (!%p189_p2)  ;;  %s711_s26 = sshll.u32 (!%p189_p2), %s706_s19, 5 }
   0x6   : > { %192 = sbr.rel (%p189_p2) target bundleno = 284 (0x11c), region = 40  ;;  %v848_v3 = vpack.c.bf16 (!%p189_p2), %v371_v1, %v370_v0  ;;  %v373_v4 = vld [vmem:[%s1196_s3 + $0x18] sm:$0xff] (!%p189_p2)  ;;  %p217_p3 = scmp.lt.s32.totalorder (!%p189_p2), %s711_s26, 127  ;;  %v374_v6 = vld [vmem:[%s1196_s3 + $0x20] sm:$0xff] (!%p189_p2)  ;;  %v375_v7 = vld [vmem:[%s1196_s3 + $0x28] sm:$0xff] (!%p189_p2) }
   0x7   : > { %v852_v5 = vpack.c.bf16 (!%p189_p2), %v373_v4, %v372_v2  ;;  %v856_v8 = vpack.c.bf16 (!%p189_p2), %v375_v7, %v374_v6  ;;  %v974_v9 = vld [vmem:[%s1194_s1] ss:$0 sm:$0xff] (!%p189_p2)  ;;  %v376_v10 = vld [vmem:[%s1196_s3 + $0x30] sm:$0xff] (!%p189_p2)  ;;  %v377_v11 = vld [vmem:[%s1196_s3 + $0x38] sm:$0xff] (!%p189_p2) }
   0x8   : > { %849 = vmatprep.subr.bf16.mxu0 (!%p189_p2), %v848_v3  ;;  %880 = vmatprep.subr.bf16.mxu1 (!%p189_p2), %v848_v3  ;;  %v993_v13 = vld [vmem:[%s1195_s2] ss:$0 sm:$0xff] (!%p189_p2)  ;;  %v860_v17 = vpack.c.bf16 (!%p189_p2), %v377_v11, %v376_v10  ;;  %v379_v19 = vld [vmem:[%s1196_s3 + $0x48] sm:$0xff] (!%p189_p2)  ;;  %v380_v25 = vld [vmem:[%s1196_s3 + $0x50] sm:$0xff] (!%p189_p2) }
   0x9   : > { %851 = vmatpush3.bf16.msra.mxu0 (!%p189_p2), %v848_v3  ;;  %888 = vmatpush3.bf16.msra.mxu1 (!%p189_p2), %v848_v3  ;;  %v378_v18 = vld [vmem:[%s1196_s3 + $0x40] sm:$0xff] (!%p189_p2)  ;;  %v381_v26 = vld [vmem:[%s1196_s3 + $0x58] sm:$0xff] (!%p189_p2)  ;;  %v383_v29 = vld [vmem:[%s1196_s3 + $0x68] sm:$0xff] (!%p189_p2) }
   0xa   : > { %853 = vmatprep.subr.bf16.mxu0 (!%p189_p2), %v852_v5  ;;  %881 = vmatprep.subr.bf16.mxu1 (!%p189_p2), %v852_v5  ;;  %v864_v24 = vpack.c.bf16 (!%p189_p2), %v379_v19, %v378_v18  ;;  %v868_v27 = vpack.c.bf16 (!%p189_p2), %v381_v26, %v380_v25  ;;  %v382_v28 = vld [vmem:[%s1196_s3 + $0x60] sm:$0xff] (!%p189_p2)  ;;  %v384_v35 = vld [vmem:[%s1196_s3 + $0x70] sm:$0xff] (!%p189_p2)  ;;  %v385_v36 = vld [vmem:[%s1196_s3 + $0x78] sm:$0xff] (!%p189_p2) }
   0xb   : > { %v872_v33 = vpack.c.bf16 (!%p189_p2), %v383_v29, %v382_v28  ;;  %v876_v43 = vpack.c.bf16 (!%p189_p2), %v385_v36, %v384_v35 }
   0xd   : > { %s1200_s26 = smov (!%p217_p3, %s711_s26), 127  ;;  %855 = vmatpush3.bf16.msra.mxu0 %v852_v5  ;;  %889 = vmatpush3.bf16.msra.mxu1 %v852_v5 }
   0xe   : > { %s712_s8 = sshll.u32 %s1200_s26, 3  ;;  %857 = vmatprep.subr.bf16.mxu0 %v856_v8  ;;  %882 = vmatprep.subr.bf16.mxu1 %v856_v8 }
   0xf   : > { %s987_s17 = scalar_lea.vmem %s1193_s0, %s712_s8  ;;  %s1124_s19 = scalar_lea.vmem %s1198_s5, %s712_s8 }
  0x10   : > { %v228_v12 = vld [vmem:[%s987_s17] sm:$0xff]  ;;  %v229_v30 = vld [vmem:[%s987_s17 + $0x8] sm:$0xff]  ;;  %v230_v32 = vld [vmem:[%s987_s17 + $0x10] sm:$0xff] }
  0x11   : > { %v244_v14 = vld [vmem:[%s987_s17 + $0x80] sm:$0xff]  ;;  %v267_v15 = vmul.f32 %v974_v9, %v228_v12  ;;  %859 = vmatpush3.bf16.msra.mxu0 %v856_v8  ;;  %890 = vmatpush3.bf16.msra.mxu1 %v856_v8  ;;  %v245_v31 = vld [vmem:[%s987_s17 + $0x88] sm:$0xff]  ;;  %v246_v34 = vld [vmem:[%s987_s17 + $0x90] sm:$0xff]  ;;  %v268_v37 = vmul.f32 %v974_v9, %v229_v30  ;;  %v269_v39 = vmul.f32 %v974_v9, %v230_v32 }
  0x12   : > { %v283_v16 = vmul.f32 %v974_v9, %v244_v14  ;;  %861 = vmatprep.subr.bf16.mxu0 %v860_v17  ;;  %883 = vmatprep.subr.bf16.mxu1 %v860_v17  ;;  %v284_v38 = vmul.f32 %v974_v9, %v245_v31  ;;  %v231_v40 = vld [vmem:[%s987_s17 + $0x18] sm:$0xff]  ;;  %v285_v41 = vmul.f32 %v974_v9, %v246_v34  ;;  %v232_v44 = vld [vmem:[%s987_s17 + $0x20] sm:$0xff]  ;;  %v233_v51 = vld [vmem:[%s987_s17 + $0x28] sm:$0xff] }
  0x13   : > { %v306_v20 = vadd.f32 %v993_v13, %v267_v15  ;;  %v247_v42 = vld [vmem:[%s987_s17 + $0x98] sm:$0xff]  ;;  %v248_v45 = vld [vmem:[%s987_s17 + $0xa0] sm:$0xff]  ;;  %v307_v46 = vadd.f32 %v993_v13, %v268_v37  ;;  %v270_v47 = vmul.f32 %v974_v9, %v231_v40  ;;  %v308_v49 = vadd.f32 %v993_v13, %v269_v39  ;;  %v249_v52 = vld [vmem:[%s987_s17 + $0xa8] sm:$0xff] }
  0x14   : > { %v322_v21 = vadd.f32 %v993_v13, %v283_v16  ;;  %v323_v48 = vadd.f32 %v993_v13, %v284_v38  ;;  %v286_v50 = vmul.f32 %v974_v9, %v247_v42  ;;  %v324_v53 = vadd.f32 %v993_v13, %v285_v41  ;;  %v234_v56 = vld [vmem:[%s987_s17 + $0x30] sm:$0xff]  ;;  %v235_v2 = vld [vmem:[%s987_s17 + $0x38] sm:$0xff]  ;;  %v236_v8 = vld [vmem:[%s987_s17 + $0x40] sm:$0xff] }
  0x15   : > { %v338_v22 = vmax.f32 %v306_v20, 0.0  ;;  %863 = vmatpush3.bf16.msra.mxu0 %v860_v17  ;;  %891 = vmatpush3.bf16.msra.mxu1 %v860_v17  ;;  %v271_v54 = vmul.f32 %v974_v9, %v232_v44  ;;  %v287_v55 = vmul.f32 %v974_v9, %v248_v45  ;;  %v250_v57 = vld [vmem:[%s987_s17 + $0xb0] sm:$0xff]  ;;  %v339_v58 = vmax.f32 %v307_v46, 0.0  ;;  %v251_v7 = vld [vmem:[%s987_s17 + $0xb8] sm:$0xff]  ;;  %v252_v10 = vld [vmem:[%s987_s17 + $0xc0] sm:$0xff] }
  0x16   : > { %v354_v23 = vmax.f32 %v322_v21, 0.0  ;;  %865 = vmatprep.subr.bf16.mxu0 %v864_v24  ;;  %884 = vmatprep.subr.bf16.mxu1 %v864_v24  ;;  %v309_v59 = vadd.f32 %v993_v13, %v270_v47  ;;  %v272_v60 = vmul.f32 %v974_v9, %v233_v51  ;;  %v288_v61 = vmul.f32 %v974_v9, %v249_v52  ;;  %v237_v20 = vld [vmem:[%s987_s17 + $0x48] sm:$0xff]  ;;  %v238_v26 = vld [vmem:[%s987_s17 + $0x50] sm:$0xff]  ;;  %v239_v36 = vld [vmem:[%s987_s17 + $0x58] sm:$0xff] }
  0x17   : > { %800 = vmatprep.mubr.f32.mxu0 %v338_v22  ;;  %v355_v62 = vmax.f32 %v323_v48, 0.0  ;;  %v325_v63 = vadd.f32 %v993_v13, %v286_v50  ;;  %v273_v0 = vmul.f32 %v974_v9, %v234_v56  ;;  %v289_v1 = vmul.f32 %v974_v9, %v250_v57  ;;  %v253_v21 = vld [vmem:[%s987_s17 + $0xc8] sm:$0xff]  ;;  %v255_v41 = vld [vmem:[%s987_s17 + $0xd8] sm:$0xff]  ;;  %v240_v42 = vld [vmem:[%s987_s17 + $0x60] sm:$0xff] }
  0x18   : > { %824 = vmatprep.mubr.f32.mxu1 %v354_v23  ;;  %v340_v3 = vmax.f32 %v308_v49, 0.0  ;;  %v356_v4 = vmax.f32 %v324_v53, 0.0  ;;  %v310_v5 = vadd.f32 %v993_v13, %v271_v54  ;;  %v326_v6 = vadd.f32 %v993_v13, %v287_v55  ;;  %v241_v52 = vld [vmem:[%s987_s17 + $0x68] sm:$0xff] }
  0x19   : > { %867 = vmatpush3.bf16.msra.mxu0 %v864_v24  ;;  %892 = vmatpush3.bf16.msra.mxu1 %v864_v24  ;;  %v341_v11 = vmax.f32 %v309_v59, 0.0  ;;  %v311_v12 = vadd.f32 %v993_v13, %v272_v60  ;;  %v327_v14 = vadd.f32 %v993_v13, %v288_v61  ;;  %v274_v15 = vmul.f32 %v974_v9, %v235_v2  ;;  %v257_v57 = vld [vmem:[%s987_s17 + $0xe8] sm:$0xff]  ;;  %v258_v59 = vld [vmem:[%s987_s17 + $0xf0] sm:$0xff] }
  0x1a   : > { %869 = vmatprep.subr.bf16.mxu0 %v868_v27  ;;  %885 = vmatprep.subr.bf16.mxu1 %v868_v27  ;;  %v357_v16 = vmax.f32 %v325_v63, 0.0  ;;  %v312_v17 = vadd.f32 %v993_v13, %v273_v0  ;;  %v328_v18 = vadd.f32 %v993_v13, %v289_v1  ;;  %v290_v19 = vmul.f32 %v974_v9, %v251_v7 }
  0x1b   : > { %v342_v22 = vmax.f32 %v310_v5, 0.0  ;;  %v358_v23 = vmax.f32 %v326_v6, 0.0  ;;  %v275_v24 = vmul.f32 %v974_v9, %v236_v8  ;;  %v291_v25 = vmul.f32 %v974_v9, %v252_v10  ;;  %v243_v8 = vld [vmem:[%s987_s17 + $0x78] sm:$0xff] }
  0x1c   : > { %v343_v28 = vmax.f32 %v311_v12, 0.0  ;;  %v313_v29 = vadd.f32 %v993_v13, %v274_v15  ;;  %v276_v30 = vmul.f32 %v974_v9, %v237_v20  ;;  %v292_v31 = vmul.f32 %v974_v9, %v253_v21  ;;  %v259_v10 = vld [vmem:[%s987_s17 + $0xf8] sm:$0xff] }
  0x1d   : > { %871 = vmatpush3.bf16.msra.mxu0 %v868_v27  ;;  %893 = vmatpush3.bf16.msra.mxu1 %v868_v27  ;;  %v254_v27 = vld [vmem:[%s987_s17 + $0xd0] sm:$0xff]  ;;  %v359_v32 = vmax.f32 %v327_v14, 0.0  ;;  %v329_v34 = vadd.f32 %v993_v13, %v290_v19  ;;  %v277_v35 = vmul.f32 %v974_v9, %v238_v26  ;;  %v360_v37 = vmax.f32 %v328_v18, 0.0 }
  0x1e   : > { %873 = vmatprep.subr.bf16.mxu0 %v872_v33  ;;  %886 = vmatprep.subr.bf16.mxu1 %v872_v33  ;;  %v314_v38 = vadd.f32 %v993_v13, %v275_v24  ;;  %v330_v39 = vadd.f32 %v993_v13, %v291_v25  ;;  %v293_v40 = vmul.f32 %v974_v9, %v254_v27  ;;  %v345_v44 = vmax.f32 %v313_v29, 0.0  ;;  %v1117_v29 = vld [vmem:[%s1197_s4] ss:$0 sm:$0xff] }
  0x1f   : > { %v315_v45 = vadd.f32 %v993_v13, %v276_v30  ;;  %v331_v46 = vadd.f32 %v993_v13, %v292_v31  ;;  %v278_v47 = vmul.f32 %v974_v9, %v239_v36  ;;  %v361_v48 = vmax.f32 %v329_v34, 0.0 }
  0x20   : > { %v316_v49 = vadd.f32 %v993_v13, %v277_v35  ;;  %v294_v50 = vmul.f32 %v974_v9, %v255_v41  ;;  %v279_v51 = vmul.f32 %v974_v9, %v240_v42  ;;  %v346_v53 = vmax.f32 %v314_v38, 0.0 }
  0x21   : > { %875 = vmatpush3.bf16.msra.mxu0 %v872_v33  ;;  %894 = vmatpush3.bf16.msra.mxu1 %v872_v33  ;;  %v344_v33 = vmax.f32 %v312_v17, 0.0  ;;  %v362_v54 = vmax.f32 %v330_v39, 0.0  ;;  %v332_v55 = vadd.f32 %v993_v13, %v293_v40  ;;  %v347_v60 = vmax.f32 %v315_v45, 0.0 }
  0x22   : > { %877 = vmatprep.subr.bf16.mxu0 %v876_v43  ;;  %887 = vmatprep.subr.bf16.mxu1 %v876_v43  ;;  %v363_v61 = vmax.f32 %v331_v46, 0.0  ;;  %v280_v63 = vmul.f32 %v974_v9, %v241_v52  ;;  %v348_v0 = vmax.f32 %v316_v49, 0.0  ;;  %v333_v1 = vadd.f32 %v993_v13, %v294_v50 }
  0x23   : > { %v318_v2 = vadd.f32 %v993_v13, %v279_v51  ;;  %v297_v7 = vmul.f32 %v974_v9, %v258_v59  ;;  %v298_v17 = vmul.f32 %v974_v9, %v259_v10 }
  0x24   : > { %v319_v12 = vadd.f32 %v993_v13, %v280_v63  ;;  %v365_v14 = vmax.f32 %v333_v1, 0.0 }
  0x25   : > { %879 = vmatpush3.bf16.msra.mxu0 %v876_v43  ;;  %895 = vmatpush3.bf16.msra.mxu1 %v876_v43  ;;  %v256_v43 = vld [vmem:[%s987_s17 + $0xe0] sm:$0xff]  ;;  %v350_v18 = vmax.f32 %v318_v2, 0.0  ;;  %v336_v21 = vadd.f32 %v993_v13, %v297_v7  ;;  %v337_v25 = vadd.f32 %v993_v13, %v298_v17 }
  0x26   : > { %v295_v56 = vmul.f32 %v974_v9, %v256_v43 }
  0x27   : > { %v368_v26 = vmax.f32 %v336_v21, 0.0 }
  0x28   : > { %801 = vmatmul.mubr.f32.vlgmr.msra.gmra.mrb[0].mxu0 %v339_v58  ;;  %825 = vmatmul.mubr.f32.vlgmr.msra.gmra.mrb[0].mxu1 %v355_v62  ;;  %v242_v58 = vld [vmem:[%s987_s17 + $0x70] sm:$0xff]  ;;  %v317_v62 = vadd.f32 %v993_v13, %v278_v47  ;;  %v334_v5 = vadd.f32 %v993_v13, %v295_v56 }
  0x29   : > { %803 = vmatprep.mubr.f32.mxu0 %v340_v3  ;;  %827 = vmatprep.mubr.f32.mxu1 %v356_v4  ;;  %v296_v3 = vmul.f32 %v974_v9, %v257_v57  ;;  %v364_v4 = vmax.f32 %v332_v55, 0.0  ;;  %v281_v6 = vmul.f32 %v974_v9, %v242_v58 }
  0x2a   : > { %v366_v19 = vmax.f32 %v334_v5, 0.0 }
  0x2b   : > { %v335_v15 = vadd.f32 %v993_v13, %v296_v3  ;;  %v320_v20 = vadd.f32 %v993_v13, %v281_v6 }
  0x2c   : > { %804 = vmatmul.mubr.f32.gmra.mrb[2].mxu0 %v341_v11  ;;  %828 = vmatmul.mubr.f32.gmra.mrb[2].mxu1 %v357_v16  ;;  %v349_v11 = vmax.f32 %v317_v62, 0.0  ;;  %v282_v16 = vmul.f32 %v974_v9, %v243_v8 }
  0x2d   : > { %806 = vmatprep.mubr.f32.mxu0 %v342_v22  ;;  %830 = vmatprep.mubr.f32.mxu1 %v358_v23  ;;  %v351_v22 = vmax.f32 %v319_v12, 0.0  ;;  %v367_v23 = vmax.f32 %v335_v15, 0.0  ;;  %v352_v9 = vmax.f32 %v320_v20, 0.0 }
  0x2e   : > { %v321_v24 = vadd.f32 %v993_v13, %v282_v16 }
  0x30   : > { %807 = vmatmul.mubr.f32.gmra.mrb[4].mxu0 %v343_v28  ;;  %831 = vmatmul.mubr.f32.gmra.mrb[4].mxu1 %v359_v32  ;;  %v353_v27 = vmax.f32 %v321_v24, 0.0  ;;  %v369_v28 = vmax.f32 %v337_v25, 0.0 }
  0x31   : > { %809 = vmatprep.mubr.f32.mxu0 %v344_v33  ;;  %833 = vmatprep.mubr.f32.mxu1 %v360_v37 }
  0x34   : > { %810 = vmatmul.mubr.f32.gmra.mrb[6].mxu0 %v345_v44  ;;  %834 = vmatmul.mubr.f32.gmra.mrb[6].mxu1 %v361_v48 }
  0x35   : > { %812 = vmatprep.mubr.f32.mxu0 %v346_v53  ;;  %836 = vmatprep.mubr.f32.mxu1 %v362_v54 }
  0x38   : > { %813 = vmatmul.mubr.f32.gmra.mrb[8].mxu0 %v347_v60  ;;  %837 = vmatmul.mubr.f32.gmra.mrb[8].mxu1 %v363_v61 }
  0x39   : > { %815 = vmatprep.mubr.f32.mxu0 %v348_v0  ;;  %839 = vmatprep.mubr.f32.mxu1 %v364_v4 }
  0x3c   : > { %816 = vmatmul.mubr.f32.gmra.mrb[10].mxu0 %v349_v11  ;;  %840 = vmatmul.mubr.f32.gmra.mrb[10].mxu1 %v365_v14 }
  0x3d   : > { %818 = vmatprep.mubr.f32.mxu0 %v350_v18  ;;  %842 = vmatprep.mubr.f32.mxu1 %v366_v19 }
  0x40   : > { %819 = vmatmul.mubr.f32.gmra.mrb[12].mxu0 %v351_v22  ;;  %843 = vmatmul.mubr.f32.gmra.mrb[12].mxu1 %v367_v23 }
  0x41   : > { %821 = vmatprep.mubr.f32.mxu0 %v352_v9  ;;  %845 = vmatprep.mubr.f32.mxu1 %v368_v26 }
  0x44   : > { %822 = vmatmul.mubr.f32.gmra.mrb[14].mxu0 %v353_v27  ;;  %846 = vmatmul.mubr.f32.gmra.mrb[14].mxu1 %v369_v28 }
  0xfb   : > { %v802_v13 = vpop.f32.mrb[0].mxu0  ;;  %v826_v30 = vpop.f32.mrb[0].mxu1 }
  0xfc   : > { %v465_v31 = vadd.f32 %v802_v13, %v1117_v29  ;;  %v545_v32 = vadd.f32 %v826_v30, %v1117_v29  ;;  %v459_v33 = vpop.f32.mrb[1].mxu0  ;;  %v539_v34 = vpop.f32.mrb[1].mxu1 }
  0xfd   : > { %v460_v35 = vadd.f32 %v1117_v29, %v459_v33  ;;  %v540_v36 = vadd.f32 %v1117_v29, %v539_v34 }
  0xfe   : > { %619 = vst [vmem:[%s1124_s19 + $0x8] sm:$0xff] %v465_v31  ;;  %635 = vst [vmem:[%s1124_s19 + $0x88] sm:$0xff] %v545_v32 }
  0xff   : > { %618 = vst [vmem:[%s1124_s19] sm:$0xff] %v460_v35  ;;  %634 = vst [vmem:[%s1124_s19 + $0x80] sm:$0xff] %v540_v36  ;;  %v805_v37 = vpop.f32.mrb[2].mxu0  ;;  %v829_v38 = vpop.f32.mrb[2].mxu1 }
 0x100   : > { %v475_v39 = vadd.f32 %v805_v37, %v1117_v29  ;;  %v555_v40 = vadd.f32 %v829_v38, %v1117_v29  ;;  %v469_v41 = vpop.f32.mrb[3].mxu0  ;;  %v549_v42 = vpop.f32.mrb[3].mxu1 }
 0x101   : > { %v470_v43 = vadd.f32 %v1117_v29, %v469_v41  ;;  %v550_v44 = vadd.f32 %v1117_v29, %v549_v42 }
 0x102   : > { %621 = vst [vmem:[%s1124_s19 + $0x18] sm:$0xff] %v475_v39  ;;  %637 = vst [vmem:[%s1124_s19 + $0x98] sm:$0xff] %v555_v40 }
 0x103   : > { %620 = vst [vmem:[%s1124_s19 + $0x10] sm:$0xff] %v470_v43  ;;  %636 = vst [vmem:[%s1124_s19 + $0x90] sm:$0xff] %v550_v44  ;;  %v808_v45 = vpop.f32.mrb[4].mxu0  ;;  %v832_v46 = vpop.f32.mrb[4].mxu1 }
 0x104   : > { %v485_v47 = vadd.f32 %v808_v45, %v1117_v29  ;;  %v565_v48 = vadd.f32 %v832_v46, %v1117_v29  ;;  %v479_v49 = vpop.f32.mrb[5].mxu0  ;;  %v559_v50 = vpop.f32.mrb[5].mxu1 }
 0x105   : > { %v480_v51 = vadd.f32 %v1117_v29, %v479_v49  ;;  %v560_v52 = vadd.f32 %v1117_v29, %v559_v50 }
 0x106   : > { %623 = vst [vmem:[%s1124_s19 + $0x28] sm:$0xff] %v485_v47  ;;  %639 = vst [vmem:[%s1124_s19 + $0xa8] sm:$0xff] %v565_v48 }
 0x107   : > { %622 = vst [vmem:[%s1124_s19 + $0x20] sm:$0xff] %v480_v51  ;;  %638 = vst [vmem:[%s1124_s19 + $0xa0] sm:$0xff] %v560_v52  ;;  %v811_v53 = vpop.f32.mrb[6].mxu0  ;;  %v835_v54 = vpop.f32.mrb[6].mxu1 }
 0x108   : > { %v495_v55 = vadd.f32 %v811_v53, %v1117_v29  ;;  %v575_v56 = vadd.f32 %v835_v54, %v1117_v29  ;;  %v489_v57 = vpop.f32.mrb[7].mxu0  ;;  %v569_v58 = vpop.f32.mrb[7].mxu1 }
 0x109   : > { %v490_v59 = vadd.f32 %v1117_v29, %v489_v57  ;;  %v570_v60 = vadd.f32 %v1117_v29, %v569_v58 }
 0x10a   : > { %625 = vst [vmem:[%s1124_s19 + $0x38] sm:$0xff] %v495_v55  ;;  %641 = vst [vmem:[%s1124_s19 + $0xb8] sm:$0xff] %v575_v56 }
 0x10b   : > { %624 = vst [vmem:[%s1124_s19 + $0x30] sm:$0xff] %v490_v59  ;;  %640 = vst [vmem:[%s1124_s19 + $0xb0] sm:$0xff] %v570_v60  ;;  %v814_v61 = vpop.f32.mrb[8].mxu0  ;;  %v838_v62 = vpop.f32.mrb[8].mxu1 }
 0x10c   : > { %v505_v63 = vadd.f32 %v814_v61, %v1117_v29  ;;  %v585_v0 = vadd.f32 %v838_v62, %v1117_v29  ;;  %v499_v1 = vpop.f32.mrb[9].mxu0  ;;  %v579_v2 = vpop.f32.mrb[9].mxu1 }
 0x10d   : > { %v500_v3 = vadd.f32 %v1117_v29, %v499_v1  ;;  %v580_v4 = vadd.f32 %v1117_v29, %v579_v2 }
 0x10e   : > { %627 = vst [vmem:[%s1124_s19 + $0x48] sm:$0xff] %v505_v63  ;;  %643 = vst [vmem:[%s1124_s19 + $0xc8] sm:$0xff] %v585_v0 }
 0x10f   : > { %626 = vst [vmem:[%s1124_s19 + $0x40] sm:$0xff] %v500_v3  ;;  %642 = vst [vmem:[%s1124_s19 + $0xc0] sm:$0xff] %v580_v4  ;;  %v817_v5 = vpop.f32.mrb[10].mxu0  ;;  %v841_v6 = vpop.f32.mrb[10].mxu1 }
 0x110   : > { %v515_v7 = vadd.f32 %v817_v5, %v1117_v29  ;;  %v595_v8 = vadd.f32 %v841_v6, %v1117_v29  ;;  %v509_v10 = vpop.f32.mrb[11].mxu0  ;;  %v589_v11 = vpop.f32.mrb[11].mxu1 }
 0x111   : > { %v510_v12 = vadd.f32 %v1117_v29, %v509_v10  ;;  %v590_v14 = vadd.f32 %v1117_v29, %v589_v11 }
 0x112   : > { %629 = vst [vmem:[%s1124_s19 + $0x58] sm:$0xff] %v515_v7  ;;  %645 = vst [vmem:[%s1124_s19 + $0xd8] sm:$0xff] %v595_v8 }
 0x113   : > { %628 = vst [vmem:[%s1124_s19 + $0x50] sm:$0xff] %v510_v12  ;;  %644 = vst [vmem:[%s1124_s19 + $0xd0] sm:$0xff] %v590_v14  ;;  %v820_v15 = vpop.f32.mrb[12].mxu0  ;;  %v844_v16 = vpop.f32.mrb[12].mxu1 }
 0x114   : > { %v525_v17 = vadd.f32 %v820_v15, %v1117_v29  ;;  %v605_v18 = vadd.f32 %v844_v16, %v1117_v29  ;;  %v519_v19 = vpop.f32.mrb[13].mxu0  ;;  %v599_v20 = vpop.f32.mrb[13].mxu1 }
 0x115   : > { %v520_v21 = vadd.f32 %v1117_v29, %v519_v19  ;;  %v600_v22 = vadd.f32 %v1117_v29, %v599_v20 }
 0x116   : > { %631 = vst [vmem:[%s1124_s19 + $0x68] sm:$0xff] %v525_v17  ;;  %647 = vst [vmem:[%s1124_s19 + $0xe8] sm:$0xff] %v605_v18 }
 0x117   : > { %630 = vst [vmem:[%s1124_s19 + $0x60] sm:$0xff] %v520_v21  ;;  %646 = vst [vmem:[%s1124_s19 + $0xe0] sm:$0xff] %v600_v22  ;;  %v823_v23 = vpop.f32.mrb[14].mxu0  ;;  %v847_v24 = vpop.f32.mrb[14].mxu1 }
 0x118   : > { %v535_v25 = vadd.f32 %v823_v23, %v1117_v29  ;;  %v615_v9 = vadd.f32 %v847_v24, %v1117_v29  ;;  %v529_v26 = vpop.f32.mrb[15].mxu0  ;;  %v609_v27 = vpop.f32.mrb[15].mxu1 }
 0x119   : > { %v530_v28 = vadd.f32 %v1117_v29, %v529_v26  ;;  %v610_v13 = vadd.f32 %v1117_v29, %v609_v27 }
 0x11a   : > { %633 = vst [vmem:[%s1124_s19 + $0x78] sm:$0xff] %v535_v25  ;;  %649 = vst [vmem:[%s1124_s19 + $0xf8] sm:$0xff] %v615_v9 }
 0x11b   : > { %632 = vst [vmem:[%s1124_s19 + $0x70] sm:$0xff] %v530_v28  ;;  %648 = vst [vmem:[%s1124_s19 + $0xf0] sm:$0xff] %v610_v13 }
 0x11c PF: > { %s15_s18 = sadd.s32 1, %s910_s18  }
 0x11d   : > { %p12_p4 = scmp.ge.s32.totalorder %s15_s18, 6  }
 0x11f   :  { %14 = sbr.rel (!%p12_p4) target bundleno = 1 (0x1), region = 70 }

// kernel: edge_model_forward.4
= control target key start
LH: loop header
LB: loop body
LE: loop exit
PB: predicated region body
PF: predicated region fallthrough
CT: control target
= control target key end

     0   :  { %s1417_s24 = smov 0   ;;  %s1910_s0 = inlined_call_operand.vmem [shape: f32[1024,128], index: 0, kind: input, shape index: {}]   ;;  %s1911_s1 = inlined_call_operand.vmem [shape: f32[1,128], index: 1, kind: input, shape index: {}]   ;;  %s1912_s2 = inlined_call_operand.vmem [shape: f32[1,128], index: 2, kind: input, shape index: {}]   ;;  %s1913_s3 = inlined_call_operand.vmem [shape: f32[128,128], index: 3, kind: input, shape index: {}]   ;;  %s1914_s4 = inlined_call_operand.vmem [shape: f32[1,128], index: 4, kind: input, shape index: {}]   ;;  %s1915_s5 = inlined_call_operand.vmem [shape: f32[1024,128], index: 5, kind: output, shape index: {0}]   ;;  %s1916_s6 = inlined_call_operand.vmem [shape: f32[4,8,128], index: 6, kind: output, shape index: {1}]   ;;  %s1917_s7 = inlined_call_operand.vmem [shape: f32[4,8,128], index: 7, kind: output, shape index: {2}]  }
   0x1 LB: > { %s1423_s25 = sadd.s32 4294967295, %s1374_s24   ;;  %p1138_p0 = scmp.ge.s32.totalorder %s1374_s24, 1  ;;  %s1374_s24 = sphi %s1417_s24, %s18_s24  }
   0x2   : > { %p243_p1 = scmp.lt.s32.totalorder %s1374_s24, 5 }
   0x4   : > { %p244_p2 = pnand %p1138_p0, %p243_p1 }
   0x5   : > { %v445_v0 = vld [vmem:[%s1913_s3] sm:$0xff] (!%p244_p2)  ;;  %v446_v1 = vld [vmem:[%s1913_s3 + $0x8] sm:$0xff] (!%p244_p2)  ;;  %v447_v2 = vld [vmem:[%s1913_s3 + $0x10] sm:$0xff] (!%p244_p2)  ;;  %s1139_s9 = sshll.u32 (!%p244_p2), %s1423_s25, 5  ;;  %p295_p4 = scmp.lt.s32.totalorder (!%p244_p2), %s1423_s25, 3 }
   0x6   : > { %247 = sbr.rel (%p244_p2) target bundleno = 324 (0x144), region = 40  ;;  %v1311_v3 = vpack.c.bf16 (!%p244_p2), %v446_v1, %v445_v0  ;;  %v448_v4 = vld [vmem:[%s1913_s3 + $0x18] sm:$0xff] (!%p244_p2)  ;;  %p284_p3 = scmp.lt.s32.totalorder (!%p244_p2), %s1139_s9, 127  ;;  %v449_v6 = vld [vmem:[%s1913_s3 + $0x20] sm:$0xff] (!%p244_p2)  ;;  %v450_v7 = vld [vmem:[%s1913_s3 + $0x28] sm:$0xff] (!%p244_p2) }
   0x7   : > { %v1315_v5 = vpack.c.bf16 (!%p244_p2), %v448_v4, %v447_v2  ;;  %v1319_v8 = vpack.c.bf16 (!%p244_p2), %v450_v7, %v449_v6  ;;  %v1452_v9 = vld [vmem:[%s1911_s1] ss:$0 sm:$0xff] (!%p244_p2)  ;;  %v451_v10 = vld [vmem:[%s1913_s3 + $0x30] sm:$0xff] (!%p244_p2)  ;;  %v452_v11 = vld [vmem:[%s1913_s3 + $0x38] sm:$0xff] (!%p244_p2) }
   0x8   : > { %1312 = vmatprep.subr.bf16.mxu0 (!%p244_p2), %v1311_v3  ;;  %1343 = vmatprep.subr.bf16.mxu1 (!%p244_p2), %v1311_v3  ;;  %v1471_v13 = vld [vmem:[%s1912_s2] ss:$0 sm:$0xff] (!%p244_p2)  ;;  %v1323_v15 = vpack.c.bf16 (!%p244_p2), %v452_v11, %v451_v10  ;;  %v454_v17 = vld [vmem:[%s1913_s3 + $0x48] sm:$0xff] (!%p244_p2)  ;;  %v455_v21 = vld [vmem:[%s1913_s3 + $0x50] sm:$0xff] (!%p244_p2) }
   0x9   : > { %1314 = vmatpush3.bf16.msra.mxu0 (!%p244_p2), %v1311_v3  ;;  %1351 = vmatpush3.bf16.msra.mxu1 (!%p244_p2), %v1311_v3  ;;  %v453_v16 = vld [vmem:[%s1913_s3 + $0x40] sm:$0xff] (!%p244_p2)  ;;  %v456_v22 = vld [vmem:[%s1913_s3 + $0x58] sm:$0xff] (!%p244_p2)  ;;  %v458_v26 = vld [vmem:[%s1913_s3 + $0x68] sm:$0xff] (!%p244_p2) }
   0xa   : > { %1316 = vmatprep.subr.bf16.mxu0 (!%p244_p2), %v1315_v5  ;;  %1344 = vmatprep.subr.bf16.mxu1 (!%p244_p2), %v1315_v5  ;;  %v1327_v20 = vpack.c.bf16 (!%p244_p2), %v454_v17, %v453_v16  ;;  %v1331_v23 = vpack.c.bf16 (!%p244_p2), %v456_v22, %v455_v21  ;;  %v457_v25 = vld [vmem:[%s1913_s3 + $0x60] sm:$0xff] (!%p244_p2)  ;;  %v459_v33 = vld [vmem:[%s1913_s3 + $0x70] sm:$0xff] (!%p244_p2)  ;;  %v460_v34 = vld [vmem:[%s1913_s3 + $0x78] sm:$0xff] (!%p244_p2) }
   0xb   : > { %v1335_v30 = vpack.c.bf16 (!%p244_p2), %v458_v26, %v457_v25  ;;  %v1339_v44 = vpack.c.bf16 (!%p244_p2), %v460_v34, %v459_v33 }
   0xd   : > { %s1919_s9 = smov (!%p284_p3, %s1139_s9), 127  ;;  %1318 = vmatpush3.bf16.msra.mxu0 %v1315_v5  ;;  %1352 = vmatpush3.bf16.msra.mxu1 %v1315_v5 }
   0xe   : > { %s1140_s16 = sshll.u32 %s1919_s9, 3  ;;  %1320 = vmatprep.subr.bf16.mxu0 %v1319_v8  ;;  %1345 = vmatprep.subr.bf16.mxu1 %v1319_v8 }
   0xf   : > { %s1465_s27 = scalar_lea.vmem %s1910_s0, %s1140_s16  ;;  %s1633_s10 = scalar_lea.vmem %s1915_s5, %s1140_s16 }
  0x10   : > { %v303_v12 = vld [vmem:[%s1465_s27] sm:$0xff]  ;;  %v304_v27 = vld [vmem:[%s1465_s27 + $0x8] sm:$0xff]  ;;  %v305_v31 = vld [vmem:[%s1465_s27 + $0x10] sm:$0xff] }
  0x11   : > { %v342_v14 = vmul.f32 %v1452_v9, %v303_v12  ;;  %1322 = vmatpush3.bf16.msra.mxu0 %v1319_v8  ;;  %1353 = vmatpush3.bf16.msra.mxu1 %v1319_v8  ;;  %v319_v24 = vld [vmem:[%s1465_s27 + $0x80] sm:$0xff]  ;;  %v320_v29 = vld [vmem:[%s1465_s27 + $0x88] sm:$0xff]  ;;  %v321_v32 = vld [vmem:[%s1465_s27 + $0x90] sm:$0xff]  ;;  %v343_v36 = vmul.f32 %v1452_v9, %v304_v27  ;;  %v344_v40 = vmul.f32 %v1452_v9, %v305_v31 }
  0x12   : > { %1324 = vmatprep.subr.bf16.mxu0 %v1323_v15  ;;  %1346 = vmatprep.subr.bf16.mxu1 %v1323_v15  ;;  %v358_v28 = vmul.f32 %v1452_v9, %v319_v24  ;;  %v306_v37 = vld [vmem:[%s1465_s27 + $0x18] sm:$0xff]  ;;  %v307_v38 = vld [vmem:[%s1465_s27 + $0x20] sm:$0xff]  ;;  %v359_v39 = vmul.f32 %v1452_v9, %v320_v29  ;;  %v360_v42 = vmul.f32 %v1452_v9, %v321_v32  ;;  %v308_v49 = vld [vmem:[%s1465_s27 + $0x28] sm:$0xff] }
  0x13   : > { %v381_v18 = vadd.f32 %v1471_v13, %v342_v14  ;;  %v322_v43 = vld [vmem:[%s1465_s27 + $0x98] sm:$0xff]  ;;  %v323_v45 = vld [vmem:[%s1465_s27 + $0xa0] sm:$0xff]  ;;  %v345_v46 = vmul.f32 %v1452_v9, %v306_v37  ;;  %v346_v47 = vmul.f32 %v1452_v9, %v307_v38  ;;  %v382_v48 = vadd.f32 %v1471_v13, %v343_v36  ;;  %v309_v50 = vld [vmem:[%s1465_s27 + $0x30] sm:$0xff] }
  0x14   : > { %v397_v35 = vadd.f32 %v1471_v13, %v358_v28  ;;  %v398_v51 = vadd.f32 %v1471_v13, %v359_v39  ;;  %v361_v52 = vmul.f32 %v1452_v9, %v322_v43  ;;  %v383_v53 = vadd.f32 %v1471_v13, %v344_v40  ;;  %v324_v56 = vld [vmem:[%s1465_s27 + $0xa8] sm:$0xff]  ;;  %v325_v57 = vld [vmem:[%s1465_s27 + $0xb0] sm:$0xff]  ;;  %v310_v63 = vld [vmem:[%s1465_s27 + $0x38] sm:$0xff] }
  0x15   : > { %v413_v19 = vmax.f32 %v381_v18, 0.0  ;;  %1326 = vmatpush3.bf16.msra.mxu0 %v1323_v15  ;;  %1354 = vmatpush3.bf16.msra.mxu1 %v1323_v15  ;;  %v399_v54 = vadd.f32 %v1471_v13, %v360_v42  ;;  %v362_v55 = vmul.f32 %v1452_v9, %v323_v45  ;;  %v384_v58 = vadd.f32 %v1471_v13, %v345_v46  ;;  %v326_v7 = vld [vmem:[%s1465_s27 + $0xb8] sm:$0xff]  ;;  %v311_v8 = vld [vmem:[%s1465_s27 + $0x40] sm:$0xff]  ;;  %v312_v17 = vld [vmem:[%s1465_s27 + $0x48] sm:$0xff] }
  0x16   : > { %1328 = vmatprep.subr.bf16.mxu0 %v1327_v20  ;;  %1347 = vmatprep.subr.bf16.mxu1 %v1327_v20  ;;  %v429_v41 = vmax.f32 %v397_v35, 0.0  ;;  %v385_v59 = vadd.f32 %v1471_v13, %v346_v47  ;;  %v347_v60 = vmul.f32 %v1452_v9, %v308_v49  ;;  %v348_v61 = vmul.f32 %v1452_v9, %v309_v50  ;;  %v327_v10 = vld [vmem:[%s1465_s27 + $0xc0] sm:$0xff]  ;;  %v313_v22 = vld [vmem:[%s1465_s27 + $0x50] sm:$0xff]  ;;  %v328_v26 = vld [vmem:[%s1465_s27 + $0xc8] sm:$0xff] }
  0x17   : > { %1263 = vmatprep.mubr.f32.mxu0 %v413_v19  ;;  %v414_v62 = vmax.f32 %v382_v48, 0.0  ;;  %v430_v0 = vmax.f32 %v398_v51, 0.0  ;;  %v400_v1 = vadd.f32 %v1471_v13, %v361_v52  ;;  %v363_v2 = vmul.f32 %v1452_v9, %v324_v56  ;;  %v329_v27 = vld [vmem:[%s1465_s27 + $0xd0] sm:$0xff]  ;;  %v314_v33 = vld [vmem:[%s1465_s27 + $0x58] sm:$0xff]  ;;  %v315_v34 = vld [vmem:[%s1465_s27 + $0x60] sm:$0xff] }
  0x18   : > { %1287 = vmatprep.mubr.f32.mxu1 %v429_v41  ;;  %v415_v3 = vmax.f32 %v383_v53, 0.0  ;;  %v431_v4 = vmax.f32 %v399_v54, 0.0  ;;  %v401_v5 = vadd.f32 %v1471_v13, %v362_v55  ;;  %v364_v6 = vmul.f32 %v1452_v9, %v325_v57  ;;  %v330_v42 = vld [vmem:[%s1465_s27 + $0xd8] sm:$0xff]  ;;  %v331_v43 = vld [vmem:[%s1465_s27 + $0xe0] sm:$0xff]  ;;  %v316_v49 = vld [vmem:[%s1465_s27 + $0x68] sm:$0xff] }
  0x19   : > { %1330 = vmatpush3.bf16.msra.mxu0 %v1327_v20  ;;  %1355 = vmatpush3.bf16.msra.mxu1 %v1327_v20  ;;  %v416_v11 = vmax.f32 %v384_v58, 0.0  ;;  %v386_v12 = vadd.f32 %v1471_v13, %v347_v60  ;;  %v387_v14 = vadd.f32 %v1471_v13, %v348_v61  ;;  %v349_v15 = vmul.f32 %v1452_v9, %v310_v63  ;;  %v332_v57 = vld [vmem:[%s1465_s27 + $0xe8] sm:$0xff]  ;;  %v317_v58 = vld [vmem:[%s1465_s27 + $0x70] sm:$0xff] }
  0x1a   : > { %1332 = vmatprep.subr.bf16.mxu0 %v1331_v23  ;;  %1348 = vmatprep.subr.bf16.mxu1 %v1331_v23  ;;  %v417_v16 = vmax.f32 %v385_v59, 0.0  ;;  %v432_v18 = vmax.f32 %v400_v1, 0.0  ;;  %v402_v19 = vadd.f32 %v1471_v13, %v363_v2  ;;  %v365_v20 = vmul.f32 %v1452_v9, %v326_v7  ;;  %v333_v59 = vld [vmem:[%s1465_s27 + $0xf0] sm:$0xff] }
  0x1b   : > { %v350_v21 = vmul.f32 %v1452_v9, %v311_v8  ;;  %v403_v24 = vadd.f32 %v1471_v13, %v364_v6  ;;  %v366_v25 = vmul.f32 %v1452_v9, %v327_v10  ;;  %v418_v28 = vmax.f32 %v386_v12, 0.0  ;;  %v334_v10 = vld [vmem:[%s1465_s27 + $0xf8] sm:$0xff] }
  0x1c   : > { %v419_v29 = vmax.f32 %v387_v14, 0.0  ;;  %v351_v31 = vmul.f32 %v1452_v9, %v312_v17  ;;  %v352_v32 = vmul.f32 %v1452_v9, %v313_v22  ;;  %v434_v35 = vmax.f32 %v402_v19, 0.0 }
  0x1d   : > { %1334 = vmatpush3.bf16.msra.mxu0 %v1331_v23  ;;  %1356 = vmatpush3.bf16.msra.mxu1 %v1331_v23  ;;  %v433_v23 = vmax.f32 %v401_v5, 0.0  ;;  %v404_v36 = vadd.f32 %v1471_v13, %v365_v20  ;;  %v367_v37 = vmul.f32 %v1452_v9, %v328_v26  ;;  %v389_v38 = vadd.f32 %v1471_v13, %v350_v21  ;;  %v318_v5 = vld [vmem:[%s1465_s27 + $0x78] sm:$0xff]  ;;  %s1148_s27 = sshll.u32 %s1423_s25, 8  ;;  %s1921_s25 = smov (!%p295_p4, %s1423_s25), 3 }
  0x1e   : > { %1336 = vmatprep.subr.bf16.mxu0 %v1335_v30  ;;  %1349 = vmatprep.subr.bf16.mxu1 %v1335_v30  ;;  %v435_v39 = vmax.f32 %v403_v24, 0.0  ;;  %v405_v40 = vadd.f32 %v1471_v13, %v366_v25  ;;  %v368_v41 = vmul.f32 %v1452_v9, %v329_v27  ;;  %v390_v45 = vadd.f32 %v1471_v13, %v351_v31  ;;  %s1143_s9 = sshll.u32 %s1921_s25, 3 }
  0x1f   : > { %v353_v46 = vmul.f32 %v1452_v9, %v314_v33  ;;  %v354_v47 = vmul.f32 %v1452_v9, %v315_v34  ;;  %v391_v48 = vadd.f32 %v1471_v13, %v352_v32  ;;  %v436_v50 = vmax.f32 %v404_v36, 0.0  ;;  %s298_s12 = scalar_lea.vmem %s1916_s6, %s1143_s9  ;;  %s302_s15 = scalar_lea.vmem %s1917_s7, %s1143_s9 }
  0x20   : > { %v406_v51 = vadd.f32 %v1471_v13, %v367_v37  ;;  %v369_v52 = vmul.f32 %v1452_v9, %v330_v42  ;;  %v421_v53 = vmax.f32 %v389_v38, 0.0  ;;  %v437_v54 = vmax.f32 %v405_v40, 0.0 }
  0x21   : > { %1338 = vmatpush3.bf16.msra.mxu0 %v1335_v30  ;;  %1357 = vmatpush3.bf16.msra.mxu1 %v1335_v30  ;;  %v388_v30 = vadd.f32 %v1471_v13, %v349_v15  ;;  %v407_v55 = vadd.f32 %v1471_v13, %v368_v41  ;;  %v370_v56 = vmul.f32 %v1452_v9, %v331_v43  ;;  %v422_v60 = vmax.f32 %v390_v45, 0.0 }
  0x22   : > { %1340 = vmatprep.subr.bf16.mxu0 %v1339_v44  ;;  %1350 = vmatprep.subr.bf16.mxu1 %v1339_v44  ;;  %v392_v61 = vadd.f32 %v1471_v13, %v353_v46  ;;  %v355_v63 = vmul.f32 %v1452_v9, %v316_v49  ;;  %v438_v1 = vmax.f32 %v406_v51, 0.0  ;;  %v408_v2 = vadd.f32 %v1471_v13, %v369_v52 }
  0x23   : > { %v439_v6 = vmax.f32 %v407_v55, 0.0  ;;  %v409_v7 = vadd.f32 %v1471_v13, %v370_v56  ;;  %v372_v8 = vmul.f32 %v1452_v9, %v333_v59  ;;  %v357_v14 = vmul.f32 %v1452_v9, %v318_v5 }
  0x24   : > { %v394_v12 = vadd.f32 %v1471_v13, %v355_v63  ;;  %v440_v15 = vmax.f32 %v408_v2, 0.0  ;;  %v373_v17 = vmul.f32 %v1452_v9, %v334_v10  ;;  %v1596_v32 = vstv %s1148_s27 }
  0x25   : > { %1342 = vmatpush3.bf16.msra.mxu0 %v1339_v44  ;;  %1358 = vmatpush3.bf16.msra.mxu1 %v1339_v44  ;;  %v420_v44 = vmax.f32 %v388_v30, 0.0  ;;  %v441_v20 = vmax.f32 %v409_v7, 0.0  ;;  %v411_v21 = vadd.f32 %v1471_v13, %v372_v8  ;;  %v1376_v51 = vmov 0.0  }
  0x26   : > { %v426_v22 = vmax.f32 %v394_v12, 0.0  ;;  %v412_v25 = vadd.f32 %v1471_v13, %v373_v17 }
  0x28   : > { %1264 = vmatmul.mubr.f32.vlgmr.msra.gmra.mrb[0].mxu0 %v414_v62  ;;  %1288 = vmatmul.mubr.f32.vlgmr.msra.gmra.mrb[0].mxu1 %v430_v0  ;;  %v393_v62 = vadd.f32 %v1471_v13, %v354_v47  ;;  %v423_v0 = vmax.f32 %v391_v48, 0.0 }
  0x29   : > { %1266 = vmatprep.mubr.f32.mxu0 %v415_v3  ;;  %1290 = vmatprep.mubr.f32.mxu1 %v431_v4  ;;  %v371_v3 = vmul.f32 %v1452_v9, %v332_v57  ;;  %v356_v4 = vmul.f32 %v1452_v9, %v317_v58  ;;  %v443_v9 = vmax.f32 %v411_v21, 0.0 }
  0x2b   : > { %v395_v19 = vadd.f32 %v1471_v13, %v356_v4 }
  0x2c   : > { %1267 = vmatmul.mubr.f32.gmra.mrb[2].mxu0 %v416_v11  ;;  %1291 = vmatmul.mubr.f32.gmra.mrb[2].mxu1 %v432_v18  ;;  %v424_v11 = vmax.f32 %v392_v61, 0.0  ;;  %v425_v18 = vmax.f32 %v393_v62, 0.0 }
  0x2d   : > { %1269 = vmatprep.mubr.f32.mxu0 %v417_v16  ;;  %1293 = vmatprep.mubr.f32.mxu1 %v433_v23  ;;  %v410_v16 = vadd.f32 %v1471_v13, %v371_v3  ;;  %v396_v23 = vadd.f32 %v1471_v13, %v357_v14  ;;  %v427_v26 = vmax.f32 %v395_v19, 0.0 }
  0x2f   : > { %v442_v24 = vmax.f32 %v410_v16, 0.0  ;;  %v428_v27 = vmax.f32 %v396_v23, 0.0 }
  0x30   : > { %1270 = vmatmul.mubr.f32.gmra.mrb[4].mxu0 %v418_v28  ;;  %1294 = vmatmul.mubr.f32.gmra.mrb[4].mxu1 %v434_v35  ;;  %v444_v28 = vmax.f32 %v412_v25, 0.0 }
  0x31   : > { %1272 = vmatprep.mubr.f32.mxu0 %v419_v29  ;;  %1296 = vmatprep.mubr.f32.mxu1 %v435_v39  ;;  %v726_v29 = vlaneseq }
  0x33   : > { %v1592_v30 = vshrl.u32 %v726_v29, 7 }
  0x34   : > { %1273 = vmatmul.mubr.f32.gmra.mrb[6].mxu0 %v420_v44  ;;  %1297 = vmatmul.mubr.f32.gmra.mrb[6].mxu1 %v436_v50 }
  0x35   : > { %1275 = vmatprep.mubr.f32.mxu0 %v421_v53  ;;  %1299 = vmatprep.mubr.f32.mxu1 %v437_v54  ;;  %v728_v31 = vadd.s32 8, %v1592_v30  ;;  %v730_v13 = vadd.s32 24, %v1592_v30  ;;  %v729_v33 = vadd.s32 16, %v1592_v30  ;;  %v760_v35 = vadd.s32 %v1596_v32, %v1592_v30  ;;  %v1622_v53 = vld [vmem:[%s1914_s4] ss:$0 sm:$0xff] }
  0x36   : > { %v732_v37 = vadd.s32 40, %v1592_v30  ;;  %v731_v39 = vadd.s32 32, %v1592_v30  ;;  %v734_v40 = vadd.s32 56, %v1592_v30  ;;  %v733_v41 = vadd.s32 48, %v1592_v30 }
  0x37   : > { %v761_v34 = vadd.s32 %v1596_v32, %v728_v31  ;;  %v763_v36 = vadd.s32 %v1596_v32, %v730_v13  ;;  %v762_v38 = vadd.s32 %v1596_v32, %v729_v33  ;;  %v736_v42 = vadd.s32 72, %v1592_v30 }
  0x38   : > { %1276 = vmatmul.mubr.f32.gmra.mrb[8].mxu0 %v422_v60  ;;  %1300 = vmatmul.mubr.f32.gmra.mrb[8].mxu1 %v438_v1  ;;  %vm792_vm1 = vcmp.lt.s32.totalorder %v760_v35, 1000  ;;  %v765_v43 = vadd.s32 %v1596_v32, %v732_v37  ;;  %v764_v44 = vadd.s32 %v1596_v32, %v731_v39  ;;  %v767_v45 = vadd.s32 %v1596_v32, %v734_v40 }
  0x39   : > { %1278 = vmatprep.mubr.f32.mxu0 %v423_v0  ;;  %1302 = vmatprep.mubr.f32.mxu1 %v439_v6  ;;  %vm793_vm0 = vcmp.lt.s32.totalorder %v761_v34, 1000  ;;  %vm795_vm2 = vcmp.lt.s32.totalorder %v763_v36, 1000  ;;  %vm794_vm3 = vcmp.lt.s32.totalorder %v762_v38, 1000  ;;  %v766_v46 = vadd.s32 %v1596_v32, %v733_v41 }
  0x3a   : > { %v769_v47 = vadd.s32 %v1596_v32, %v736_v42  ;;  %v735_v48 = vadd.s32 64, %v1592_v30  ;;  %v738_v49 = vadd.s32 88, %v1592_v30  ;;  %v737_v50 = vadd.s32 80, %v1592_v30 }
  0x3b   : > { %v1150_v52 = vsel %vm793_vm0, 1.0, %v1376_v51  ;;  %v1149_v54 = vsel %vm792_vm1, 1.0, %v1376_v51  ;;  %v1152_v55 = vsel %vm795_vm2, 1.0, %v1376_v51  ;;  %vm797_vm4 = vcmp.lt.s32.totalorder %v765_v43, 1000 }
  0x3c   : > { %1279 = vmatmul.mubr.f32.gmra.mrb[10].mxu0 %v424_v11  ;;  %1303 = vmatmul.mubr.f32.gmra.mrb[10].mxu1 %v440_v15  ;;  %v740_v56 = vadd.s32 104, %v1592_v30  ;;  %v1151_v57 = vsel %vm794_vm3, 1.0, %v1376_v51  ;;  %vm796_vm5 = vcmp.lt.s32.totalorder %v764_v44, 1000  ;;  %vm799_vm6 = vcmp.lt.s32.totalorder %v767_v45, 1000 }
  0x3d   : > { %1281 = vmatprep.mubr.f32.mxu0 %v425_v18  ;;  %1305 = vmatprep.mubr.f32.mxu1 %v441_v20  ;;  %vm798_vm7 = vcmp.lt.s32.totalorder %v766_v46, 1000  ;;  %vm801_vm8 = vcmp.lt.s32.totalorder %v769_v47, 1000  ;;  %v768_v59 = vadd.s32 %v1596_v32, %v735_v48  ;;  %v771_v60 = vadd.s32 %v1596_v32, %v738_v49 }
  0x3e   : > { %v770_v61 = vadd.s32 %v1596_v32, %v737_v50  ;;  %v1154_v1 = vsel %vm797_vm4, 1.0, %v1376_v51  ;;  %v739_v2 = vadd.s32 96, %v1592_v30  ;;  %v1153_v6 = vsel %vm796_vm5, 1.0, %v1376_v51 }
  0x3f   : > { %v773_v7 = vadd.s32 %v1596_v32, %v740_v56  ;;  %v1654_v11 = vsel %vm799_vm6, 1.0, %v1376_v51  ;;  %v1658_v12 = vsel %vm798_vm7, 1.0, %v1376_v51  ;;  %v1662_v14 = vsel %vm801_vm8, 1.0, %v1376_v51 }
  0x40   : > { %1282 = vmatmul.mubr.f32.gmra.mrb[12].mxu0 %v426_v22  ;;  %1306 = vmatmul.mubr.f32.gmra.mrb[12].mxu1 %v442_v24  ;;  %vm800_vm9 = vcmp.lt.s32.totalorder %v768_v59, 1000  ;;  %vm803_vm10 = vcmp.lt.s32.totalorder %v771_v60, 1000  ;;  %vm802_vm11 = vcmp.lt.s32.totalorder %v770_v61, 1000  ;;  %v1671_v21 = vadd.s32 %v1596_v32, %v739_v2 }
  0x41   : > { %1284 = vmatprep.mubr.f32.mxu0 %v427_v26  ;;  %1308 = vmatprep.mubr.f32.mxu1 %v443_v9  ;;  %vm805_vm12 = vcmp.lt.s32.totalorder %v773_v7, 1000  ;;  %v1680_v9 = vsel %vm800_vm9, 1.0, %v1376_v51  ;;  %v1695_v35 = vsel %vm802_vm11, 1.0, %v1376_v51  ;;  %v741_v40 = vadd.s32 112, %v1592_v30 }
  0x42   : > { %v1700_v39 = vsel %vm805_vm12, 1.0, %v1376_v51  ;;  %vm804_vm13 = vcmp.lt.s32.totalorder %v1671_v21, 1000  ;;  %v744_v48 = vadd.s32 136, %v1592_v30  ;;  %v743_v61 = vadd.s32 128, %v1592_v30 }
  0x43   : > { %v774_v60 = vadd.s32 %v1596_v32, %v741_v40 }
  0x44   : > { %1285 = vmatmul.mubr.f32.gmra.mrb[14].mxu0 %v428_v27  ;;  %1309 = vmatmul.mubr.f32.gmra.mrb[14].mxu1 %v444_v28  ;;  %v1684_v27 = vsel %vm803_vm10, 1.0, %v1376_v51  ;;  %v742_v28 = vadd.s32 120, %v1592_v30  ;;  %v1731_v7 = vadd.s32 %v1596_v32, %v744_v48 }
  0x45   : > { %vm806_vm15 = vcmp.lt.s32.totalorder %v774_v60, 1000 }
  0x46   : > { %v775_v47 = vadd.s32 %v1596_v32, %v742_v28  ;;  %vm809_vm1 = vcmp.lt.s32.totalorder %v1731_v7, 1000 }
  0x48   : > { %vm807_vm14 = vcmp.lt.s32.totalorder %v775_v47, 1000  ;;  %v745_v47 = vadd.s32 144, %v1592_v30 }
  0xfb   : > { %v1265_v58 = vpop.f32.mrb[0].mxu0  ;;  %v1289_v62 = vpop.f32.mrb[0].mxu1 }
  0xfc   : > { %v540_v63 = vadd.f32 %v1265_v58, %v1622_v53  ;;  %v534_v0 = vpop.f32.mrb[1].mxu0  ;;  %v1642_v3 = vadd.f32 %v1289_v62, %v1622_v53  ;;  %v614_v4 = vpop.f32.mrb[1].mxu1 }
  0xfd   : > { %v535_v5 = vadd.f32 %v1622_v53, %v534_v0  ;;  %v1649_v8 = vadd.f32 %v1622_v53, %v614_v4 }
  0xfe   : > { %694 = vst [vmem:[%s1633_s10 + $0x8] sm:$0xff] %v540_v63  ;;  %v889_v10 = vmul.f32 %v1150_v52, %v540_v63  ;;  %710 = vst [vmem:[%s1633_s10 + $0x88] sm:$0xff] %v1642_v3 }
  0xff   : > { %693 = vst [vmem:[%s1633_s10] sm:$0xff] %v535_v5  ;;  %v888_v15 = vmul.f32 %v1149_v54, %v535_v5  ;;  %v1268_v16 = vpop.f32.mrb[2].mxu0  ;;  %709 = vst [vmem:[%s1633_s10 + $0x80] sm:$0xff] %v1649_v8  ;;  %v1292_v17 = vpop.f32.mrb[2].mxu1 }
 0x100   : > { %v953_v18 = vmul.f32 %v889_v10, %v540_v63  ;;  %v550_v19 = vadd.f32 %v1268_v16, %v1622_v53  ;;  %v544_v20 = vpop.f32.mrb[3].mxu0  ;;  %v1674_v22 = vadd.f32 %v1292_v17, %v1622_v53  ;;  %v624_v23 = vpop.f32.mrb[3].mxu1 }
 0x101   : > { %v920_v24 = vadd.f32 %v889_v10, %v888_v15  ;;  %v952_v25 = vmul.f32 %v888_v15, %v535_v5  ;;  %v545_v26 = vadd.f32 %v1622_v53, %v544_v20  ;;  %v1690_v29 = vadd.f32 %v1622_v53, %v624_v23 }
 0x102   : > { %696 = vst [vmem:[%s1633_s10 + $0x18] sm:$0xff] %v550_v19  ;;  %712 = vst [vmem:[%s1633_s10 + $0x98] sm:$0xff] %v1674_v22  ;;  %v891_v13 = vmul.f32 %v1152_v55, %v550_v19  ;;  %v776_v23 = vadd.s32 %v1596_v32, %v743_v61 }
 0x103   : > { %v984_v31 = vadd.f32 %v953_v18, %v952_v25  ;;  %695 = vst [vmem:[%s1633_s10 + $0x10] sm:$0xff] %v545_v26  ;;  %v890_v33 = vmul.f32 %v1151_v57, %v545_v26  ;;  %v1271_v34 = vpop.f32.mrb[4].mxu0  ;;  %v1295_v36 = vpop.f32.mrb[4].mxu1  ;;  %711 = vst [vmem:[%s1633_s10 + $0x90] sm:$0xff] %v1690_v29 }
 0x104   : > { %v560_v37 = vadd.f32 %v1271_v34, %v1622_v53  ;;  %v554_v38 = vpop.f32.mrb[5].mxu0  ;;  %v634_v41 = vpop.f32.mrb[5].mxu1  ;;  %v1708_v45 = vadd.f32 %v1295_v36, %v1622_v53  ;;  %v955_v50 = vmul.f32 %v891_v13, %v550_v19  ;;  %v1754_v34 = vsel %vm807_vm14, 1.0, %v1376_v51 }
 0x105   : > { %v921_v42 = vadd.f32 %v920_v24, %v890_v33  ;;  %v954_v43 = vmul.f32 %v890_v33, %v545_v26  ;;  %v555_v44 = vadd.f32 %v1622_v53, %v554_v38  ;;  %v1714_v49 = vadd.f32 %v1622_v53, %v634_v41 }
 0x106   : > { %698 = vst [vmem:[%s1633_s10 + $0x28] sm:$0xff] %v560_v37  ;;  %v893_v46 = vmul.f32 %v1154_v1, %v560_v37  ;;  %714 = vst [vmem:[%s1633_s10 + $0xa8] sm:$0xff] %v1708_v45  ;;  %v1161_v33 = vsel %vm804_vm13, 1.0, %v1376_v51  ;;  %vm808_vm0 = vcmp.lt.s32.totalorder %v776_v23, 1000 }
 0x107   : > { %v985_v52 = vadd.f32 %v984_v31, %v954_v43  ;;  %697 = vst [vmem:[%s1633_s10 + $0x20] sm:$0xff] %v555_v44  ;;  %v892_v54 = vmul.f32 %v1153_v6, %v555_v44  ;;  %v922_v55 = vadd.f32 %v921_v42, %v891_v13  ;;  %v1274_v56 = vpop.f32.mrb[6].mxu0  ;;  %v1298_v57 = vpop.f32.mrb[6].mxu1  ;;  %713 = vst [vmem:[%s1633_s10 + $0xa0] sm:$0xff] %v1714_v49 }
 0x108   : > { %v570_v58 = vadd.f32 %v1274_v56, %v1622_v53  ;;  %v564_v59 = vpop.f32.mrb[7].mxu0  ;;  %v1725_v62 = vadd.f32 %v1298_v57, %v1622_v53  ;;  %v644_v63 = vpop.f32.mrb[7].mxu1  ;;  %v957_v5 = vmul.f32 %v893_v46, %v560_v37 }
 0x109   : > { %v923_v0 = vadd.f32 %v922_v55, %v892_v54  ;;  %v956_v1 = vmul.f32 %v892_v54, %v555_v44  ;;  %v986_v2 = vadd.f32 %v985_v52, %v955_v50  ;;  %v565_v4 = vadd.f32 %v1622_v53, %v564_v59 }
 0x10a   : > { %700 = vst [vmem:[%s1633_s10 + $0x38] sm:$0xff] %v570_v58  ;;  %v895_v6 = vmul.f32 %v1654_v11, %v570_v58  ;;  %716 = vst [vmem:[%s1633_s10 + $0xb8] sm:$0xff] %v1725_v62  ;;  %v1738_v18 = vadd.f32 %v1622_v53, %v644_v63  ;;  %v746_v55 = vadd.s32 152, %v1592_v30 }
 0x10b   : > { %v987_v10 = vadd.f32 %v986_v2, %v956_v1  ;;  %699 = vst [vmem:[%s1633_s10 + $0x30] sm:$0xff] %v565_v4  ;;  %v894_v15 = vmul.f32 %v1658_v12, %v565_v4  ;;  %v924_v16 = vadd.f32 %v923_v0, %v893_v46  ;;  %v1277_v17 = vpop.f32.mrb[8].mxu0  ;;  %v1301_v19 = vpop.f32.mrb[8].mxu1  ;;  %v1767_v46 = vsel %vm806_vm15, 1.0, %v1376_v51 }
 0x10c   : > { %v580_v11 = vadd.f32 %v1277_v17, %v1622_v53  ;;  %v574_v20 = vpop.f32.mrb[9].mxu0  ;;  %v1743_v24 = vadd.f32 %v1301_v19, %v1622_v53  ;;  %v654_v25 = vpop.f32.mrb[9].mxu1  ;;  %715 = vst [vmem:[%s1633_s10 + $0xb0] sm:$0xff] %v1738_v18  ;;  %v959_v13 = vmul.f32 %v895_v6, %v570_v58  ;;  %v1165_v2 = vsel %vm808_vm0, 1.0, %v1376_v51 }
 0x10d   : > { %v925_v12 = vadd.f32 %v924_v16, %v894_v15  ;;  %v958_v26 = vmul.f32 %v894_v15, %v565_v4  ;;  %v988_v28 = vadd.f32 %v987_v10, %v957_v5  ;;  %v575_v31 = vadd.f32 %v1622_v53, %v574_v20 }
 0x10e   : > { %702 = vst [vmem:[%s1633_s10 + $0x48] sm:$0xff] %v580_v11  ;;  %718 = vst [vmem:[%s1633_s10 + $0xc8] sm:$0xff] %v1743_v24  ;;  %v1759_v36 = vadd.f32 %v1622_v53, %v654_v25  ;;  %v897_v38 = vmul.f32 %v1662_v14, %v580_v11  ;;  %v778_v4 = vadd.s32 %v1596_v32, %v745_v47  ;;  %v747_v5 = vadd.s32 160, %v1592_v30 }
 0x10f   : > { %v989_v37 = vadd.f32 %v988_v28, %v958_v26  ;;  %701 = vst [vmem:[%s1633_s10 + $0x40] sm:$0xff] %v575_v31  ;;  %v896_v40 = vmul.f32 %v1680_v9, %v575_v31  ;;  %v926_v41 = vadd.f32 %v925_v12, %v895_v6  ;;  %v1280_v21 = vpop.f32.mrb[10].mxu0  ;;  %v1304_v42 = vpop.f32.mrb[10].mxu1  ;;  %v749_v47 = vadd.s32 176, %v1592_v30 }
 0x110   : > { %v590_v43 = vadd.f32 %v1280_v21, %v1622_v53  ;;  %v584_v44 = vpop.f32.mrb[11].mxu0  ;;  %717 = vst [vmem:[%s1633_s10 + $0xc0] sm:$0xff] %v1759_v36  ;;  %v664_v14 = vpop.f32.mrb[11].mxu1  ;;  %v1778_v56 = vadd.f32 %v1304_v42, %v1622_v53  ;;  %v961_v58 = vmul.f32 %v897_v38, %v580_v11  ;;  %v779_v11 = vadd.s32 %v1596_v32, %v746_v55 }
 0x111   : > { %v927_v48 = vadd.f32 %v926_v41, %v896_v40  ;;  %v960_v9 = vmul.f32 %v896_v40, %v575_v31  ;;  %v990_v50 = vadd.f32 %v989_v37, %v959_v13  ;;  %v585_v52 = vadd.f32 %v1622_v53, %v584_v44 }
 0x112   : > { %704 = vst [vmem:[%s1633_s10 + $0x58] sm:$0xff] %v590_v43  ;;  %v899_v54 = vmul.f32 %v1684_v27, %v590_v43  ;;  %v1781_v57 = vadd.f32 %v1622_v53, %v664_v14  ;;  %720 = vst [vmem:[%s1633_s10 + $0xd8] sm:$0xff] %v1778_v56  ;;  %vm810_vm2 = vcmp.lt.s32.totalorder %v778_v4, 1000  ;;  %vm811_vm3 = vcmp.lt.s32.totalorder %v779_v11, 1000 }
 0x113   : > { %v991_v59 = vadd.f32 %v990_v50, %v960_v9  ;;  %703 = vst [vmem:[%s1633_s10 + $0x50] sm:$0xff] %v585_v52  ;;  %v898_v60 = vmul.f32 %v1695_v35, %v585_v52  ;;  %v928_v61 = vadd.f32 %v927_v48, %v897_v38  ;;  %v1283_v63 = vpop.f32.mrb[12].mxu0  ;;  %v1307_v0 = vpop.f32.mrb[12].mxu1  ;;  %v780_v38 = vadd.s32 %v1596_v32, %v747_v5 }
 0x114   : > { %v600_v27 = vadd.f32 %v1283_v63, %v1622_v53  ;;  %v594_v1 = vpop.f32.mrb[13].mxu0  ;;  %719 = vst [vmem:[%s1633_s10 + $0xd0] sm:$0xff] %v1781_v57  ;;  %v674_v35 = vpop.f32.mrb[13].mxu1  ;;  %v963_v17 = vmul.f32 %v899_v54, %v590_v43  ;;  %v1799_v20 = vadd.f32 %v1307_v0, %v1622_v53  ;;  %v750_v55 = vadd.s32 184, %v1592_v30 }
 0x115   : > { %v929_v6 = vadd.f32 %v928_v61, %v898_v60  ;;  %v962_v10 = vmul.f32 %v898_v60, %v585_v52  ;;  %v992_v15 = vadd.f32 %v991_v59, %v961_v58  ;;  %v595_v16 = vadd.f32 %v1622_v53, %v594_v1 }
 0x116   : > { %706 = vst [vmem:[%s1633_s10 + $0x68] sm:$0xff] %v600_v27  ;;  %v901_v19 = vmul.f32 %v1700_v39, %v600_v27  ;;  %v1803_v28 = vadd.f32 %v1622_v53, %v674_v35  ;;  %v748_v39 = vadd.s32 168, %v1592_v30  ;;  %722 = vst [vmem:[%s1633_s10 + $0xe8] sm:$0xff] %v1799_v20  ;;  %vm812_vm4 = vcmp.lt.s32.totalorder %v780_v38, 1000 }
 0x117   : > { %v993_v23 = vadd.f32 %v992_v15, %v962_v10  ;;  %705 = vst [vmem:[%s1633_s10 + $0x60] sm:$0xff] %v595_v16  ;;  %v900_v25 = vmul.f32 %v1161_v33, %v595_v16  ;;  %v930_v12 = vadd.f32 %v929_v6, %v899_v54  ;;  %v1286_v26 = vpop.f32.mrb[14].mxu0  ;;  %v1310_v31 = vpop.f32.mrb[14].mxu1  ;;  %v1166_v54 = vsel %vm809_vm1, 1.0, %v1376_v51 }
 0x118   : > { %v610_v13 = vadd.f32 %v1286_v26, %v1622_v53  ;;  %v604_v37 = vpop.f32.mrb[15].mxu0  ;;  %v684_v33 = vpop.f32.mrb[15].mxu1  ;;  %721 = vst [vmem:[%s1633_s10 + $0xe0] sm:$0xff] %v1803_v28  ;;  %v965_v43 = vmul.f32 %v901_v19, %v600_v27  ;;  %v1817_v14 = vadd.f32 %v1310_v31, %v1622_v53  ;;  %v782_v7 = vadd.s32 %v1596_v32, %v749_v47 }
 0x119   : > { %v931_v40 = vadd.f32 %v930_v12, %v900_v25  ;;  %v964_v41 = vmul.f32 %v900_v25, %v595_v16  ;;  %v994_v21 = vadd.f32 %v993_v23, %v963_v17  ;;  %v605_v42 = vadd.f32 %v1622_v53, %v604_v37 }
 0x11a   : > { %708 = vst [vmem:[%s1633_s10 + $0x78] sm:$0xff] %v610_v13  ;;  %v903_v44 = vmul.f32 %v1754_v34, %v610_v13  ;;  %v1822_v52 = vadd.f32 %v1622_v53, %v684_v33  ;;  %v781_v34 = vadd.s32 %v1596_v32, %v748_v39  ;;  %724 = vst [vmem:[%s1633_s10 + $0xf8] sm:$0xff] %v1817_v14  ;;  %v1167_v53 = vsel %vm810_vm2, 1.0, %v1376_v51 }
 0x11b   : > { %v995_v48 = vadd.f32 %v994_v21, %v964_v41  ;;  %707 = vst [vmem:[%s1633_s10 + $0x70] sm:$0xff] %v605_v42  ;;  %v902_v9 = vmul.f32 %v1767_v46, %v605_v42  ;;  %v932_v50 = vadd.f32 %v931_v40, %v901_v19  ;;  %v904_v46 = vmul.f32 %v1165_v2, %v1649_v8 }
 0x11c   : > { %723 = vst [vmem:[%s1633_s10 + $0xf0] sm:$0xff] %v1822_v52  ;;  %v751_v61 = vadd.s32 192, %v1592_v30  ;;  %v967_v63 = vmul.f32 %v903_v44, %v610_v13  ;;  %v905_v27 = vmul.f32 %v1166_v54, %v1642_v3  ;;  %v1168_v5 = vsel %vm811_vm3, 1.0, %v1376_v51 }
 0x11d   : > { %v933_v58 = vadd.f32 %v932_v50, %v902_v9  ;;  %v966_v59 = vmul.f32 %v902_v9, %v605_v42  ;;  %v996_v60 = vadd.f32 %v995_v48, %v965_v43  ;;  %vm813_vm5 = vcmp.lt.s32.totalorder %v781_v34, 1000 }
 0x11e   : > { %v783_v2 = vadd.s32 %v1596_v32, %v750_v55  ;;  %v752_v35 = vadd.s32 200, %v1592_v30  ;;  %v968_v6 = vmul.f32 %v904_v46, %v1649_v8  ;;  %v906_v15 = vmul.f32 %v1167_v53, %v1690_v29 }
 0x11f   : > { %v997_v0 = vadd.f32 %v996_v60, %v966_v59  ;;  %v934_v1 = vadd.f32 %v933_v58, %v903_v44  ;;  %v1169_v16 = vsel %vm812_vm4, 1.0, %v1376_v51  ;;  %vm814_vm6 = vcmp.lt.s32.totalorder %v782_v7, 1000 }
 0x120   : > { %v784_v17 = vadd.s32 %v1596_v32, %v751_v61  ;;  %v753_v19 = vadd.s32 208, %v1592_v30  ;;  %v969_v11 = vmul.f32 %v905_v27, %v1642_v3  ;;  %v907_v25 = vmul.f32 %v1168_v5, %v1674_v22 }
 0x121   : > { %v935_v4 = vadd.f32 %v934_v1, %v904_v46  ;;  %v998_v10 = vadd.f32 %v997_v0, %v967_v63  ;;  %v1170_v26 = vsel %vm813_vm5, 1.0, %v1376_v51  ;;  %vm815_vm7 = vcmp.lt.s32.totalorder %v783_v2, 1000 }
 0x122   : > { %v785_v8 = vadd.s32 %v1596_v32, %v752_v35  ;;  %v754_v31 = vadd.s32 216, %v1592_v30  ;;  %v970_v37 = vmul.f32 %v906_v15, %v1690_v29  ;;  %v908_v38 = vmul.f32 %v1169_v16, %v1714_v49 }
 0x123   : > { %v999_v23 = vadd.f32 %v998_v10, %v968_v6  ;;  %v936_v12 = vadd.f32 %v935_v4, %v905_v27  ;;  %v1171_v33 = vsel %vm814_vm6, 1.0, %v1376_v51  ;;  %vm816_vm8 = vcmp.lt.s32.totalorder %v784_v17, 1000 }
 0x124   : > { %v786_v3 = vadd.s32 %v1596_v32, %v753_v19  ;;  %v755_v40 = vadd.s32 224, %v1592_v30  ;;  %v971_v41 = vmul.f32 %v907_v25, %v1674_v22  ;;  %v909_v42 = vmul.f32 %v1170_v26, %v1708_v45 }
 0x125   : > { %v937_v13 = vadd.f32 %v936_v12, %v906_v15  ;;  %v1000_v39 = vadd.f32 %v999_v23, %v969_v11  ;;  %v1172_v44 = vsel %vm815_vm7, 1.0, %v1376_v51  ;;  %vm817_vm9 = vcmp.lt.s32.totalorder %v785_v8, 1000 }
 0x126   : > { %v787_v29 = vadd.s32 %v1596_v32, %v754_v31  ;;  %v756_v47 = vadd.s32 232, %v1592_v30  ;;  %v972_v9 = vmul.f32 %v908_v38, %v1714_v49  ;;  %v910_v54 = vmul.f32 %v1171_v33, %v1738_v18 }
 0x127   : > { %v1001_v21 = vadd.f32 %v1000_v39, %v970_v37  ;;  %v938_v43 = vadd.f32 %v937_v13, %v907_v25  ;;  %v1173_v34 = vsel %vm816_vm8, 1.0, %v1376_v51  ;;  %vm818_vm10 = vcmp.lt.s32.totalorder %v786_v3, 1000 }
 0x128   : > { %v788_v22 = vadd.s32 %v1596_v32, %v755_v40  ;;  %v757_v55 = vadd.s32 240, %v1592_v30  ;;  %v973_v58 = vmul.f32 %v909_v42, %v1708_v45  ;;  %v911_v60 = vmul.f32 %v1172_v44, %v1725_v62 }
 0x129   : > { %v939_v48 = vadd.f32 %v938_v43, %v908_v38  ;;  %v1002_v50 = vadd.f32 %v1001_v21, %v971_v41  ;;  %v1174_v53 = vsel %vm817_vm9, 1.0, %v1376_v51  ;;  %vm819_vm11 = vcmp.lt.s32.totalorder %v787_v29, 1000 }
 0x12a   : > { %v789_v49 = vadd.s32 %v1596_v32, %v756_v47  ;;  %v758_v7 = vadd.s32 248, %v1592_v30  ;;  %v974_v63 = vmul.f32 %v910_v54, %v1738_v18  ;;  %v912_v27 = vmul.f32 %v1173_v34, %v1759_v36 }
 0x12b   : > { %v1003_v59 = vadd.f32 %v1002_v50, %v972_v9  ;;  %v940_v46 = vadd.f32 %v939_v48, %v909_v42  ;;  %v1175_v1 = vsel %vm818_vm10, 1.0, %v1376_v51  ;;  %vm820_vm12 = vcmp.lt.s32.totalorder %v788_v22, 1000 }
 0x12c   : > { %v790_v45 = vadd.s32 %v1596_v32, %v757_v55  ;;  %v975_v5 = vmul.f32 %v911_v60, %v1725_v62  ;;  %v913_v35 = vmul.f32 %v1174_v53, %v1743_v24  ;;  %v1176_v30 = vsel %vm819_vm11, 1.0, %v1376_v51 }
 0x12d   : > { %v941_v61 = vadd.f32 %v940_v46, %v910_v54  ;;  %v1004_v0 = vadd.f32 %v1003_v59, %v973_v58  ;;  %vm821_vm13 = vcmp.lt.s32.totalorder %v789_v49, 1000  ;;  %v791_v18 = vadd.s32 %v1596_v32, %v758_v7 }
 0x12e   : > { %v976_v10 = vmul.f32 %v912_v27, %v1759_v36  ;;  %v914_v16 = vmul.f32 %v1175_v1, %v1781_v57  ;;  %v1177_v17 = vsel %vm820_vm12, 1.0, %v1376_v51  ;;  %vm822_vm14 = vcmp.lt.s32.totalorder %v790_v45, 1000 }
 0x12f   : > { %v1005_v2 = vadd.f32 %v1004_v0, %v974_v63  ;;  %v942_v4 = vadd.f32 %v941_v61, %v911_v60  ;;  %v977_v62 = vmul.f32 %v913_v35, %v1743_v24  ;;  %v915_v11 = vmul.f32 %v1176_v30, %v1778_v56 }
 0x130   : > { %v1178_v25 = vsel %vm821_vm13, 1.0, %v1376_v51  ;;  %vm823_vm15 = vcmp.lt.s32.totalorder %v791_v18, 1000  ;;  %v978_v36 = vmul.f32 %v914_v16, %v1781_v57  ;;  %v916_v26 = vmul.f32 %v1177_v17, %v1803_v28 }
 0x131   : > { %v943_v6 = vadd.f32 %v942_v4, %v912_v27  ;;  %v1006_v15 = vadd.f32 %v1005_v2, %v975_v5  ;;  %v1179_v8 = vsel %vm822_vm14, 1.0, %v1376_v51  ;;  %v979_v31 = vmul.f32 %v915_v11, %v1778_v56 }
 0x132   : > { %v917_v13 = vmul.f32 %v1178_v25, %v1799_v20  ;;  %v1180_v39 = vsel %vm823_vm15, 1.0, %v1376_v51  ;;  %v980_v33 = vmul.f32 %v916_v26, %v1803_v28  ;;  %v918_v57 = vmul.f32 %v1179_v8, %v1822_v52 }
 0x133   : > { %v1007_v19 = vadd.f32 %v1006_v15, %v976_v10  ;;  %v944_v23 = vadd.f32 %v943_v6, %v913_v35  ;;  %v919_v21 = vmul.f32 %v1180_v39, %v1817_v14 }
 0x134   : > { %v981_v40 = vmul.f32 %v917_v13, %v1799_v20  ;;  %v982_v43 = vmul.f32 %v918_v57, %v1822_v52 }
 0x135   : > { %v945_v32 = vadd.f32 %v944_v23, %v914_v16  ;;  %v1008_v12 = vadd.f32 %v1007_v19, %v977_v62  ;;  %v983_v51 = vmul.f32 %v919_v21, %v1817_v14 }
 0x137   : > { %v1009_v24 = vadd.f32 %v1008_v12, %v978_v36  ;;  %v946_v37 = vadd.f32 %v945_v32, %v915_v11 }
 0x139   : > { %v947_v38 = vadd.f32 %v946_v37, %v916_v26  ;;  %v1010_v3 = vadd.f32 %v1009_v24, %v979_v31 }
 0x13b   : > { %v1011_v41 = vadd.f32 %v1010_v3, %v980_v33  ;;  %v948_v56 = vadd.f32 %v947_v38, %v917_v13 }
 0x13d   : > { %v949_v42 = vadd.f32 %v948_v56, %v918_v57  ;;  %v1012_v44 = vadd.f32 %v1011_v41, %v981_v40 }
 0x13f   : > { %v950_v28 = vadd.f32 %v949_v42, %v919_v21  ;;  %v1013_v29 = vadd.f32 %v1012_v44, %v982_v43 }
 0x141   : > { %951 = vst [vmem:[%s298_s12] sm:$0xff] %v950_v28  ;;  %v1014_v20 = vadd.f32 %v1013_v29, %v983_v51 }
 0x143   : > { %1015 = vst [vmem:[%s302_s15] sm:$0xff] %v1014_v20 }
 0x144 PF: > { %s18_s24 = sadd.s32 1, %s1374_s24  }
 0x145   : > { %p15_p5 = scmp.ge.s32.totalorder %s18_s24, 6  }
 0x147   :  { %17 = sbr.rel (!%p15_p5) target bundleno = 1 (0x1), region = 94 }

// kernel: edge_model_forward.3
= control target key start
LH: loop header
LB: loop body
LE: loop exit
PB: predicated region body
PF: predicated region fallthrough
CT: control target
= control target key end

     0   :  { %s2592_s30 = smov 0   ;;  %s3177_s0 = inlined_call_operand.vmem [shape: f32[1024,32], index: 0, kind: input, shape index: {}]   ;;  %s3178_s1 = inlined_call_operand.vmem [shape: f32[1024,32], index: 1, kind: input, shape index: {}]   ;;  %s3179_s2 = inlined_call_operand.vmem [shape: f32[1024,32], index: 2, kind: input, shape index: {}]   ;;  %s3180_s3 = inlined_call_operand.vmem [shape: f32[32,128], index: 3, kind: input, shape index: {}]   ;;  %s3181_s4 = inlined_call_operand.vmem [shape: f32[32,128], index: 4, kind: input, shape index: {}]   ;;  %s3182_s5 = inlined_call_operand.vmem [shape: f32[32,128], index: 5, kind: input, shape index: {}]   ;;  %s3183_s6 = inlined_call_operand.vmem [shape: f32[1,128], index: 6, kind: input, shape index: {}]   ;;  %s3184_s7 = inlined_call_operand.vmem [shape: f32[1024,128], index: 7, kind: output, shape index: {0}]   ;;  %s3185_s8 = inlined_call_operand.vmem [shape: f32[4,8,128], index: 8, kind: output, shape index: {1}]   ;;  %s3186_s9 = inlined_call_operand.vmem [shape: f32[4,8,128], index: 9, kind: output, shape index: {2}]  }
   0x1 LB: > { %s2598_s10 = sadd.s32 4294967295, %s2539_s30   ;;  %p2013_p0 = scmp.ge.s32.totalorder %s2539_s30, 1  ;;  %s2539_s30 = sphi %s2592_s30, %s20_s30  }
   0x2   : > { %p315_p1 = scmp.lt.s32.totalorder %s2539_s30, 5 }
   0x4   : > { %p316_p2 = pnand %p2013_p0, %p315_p1 }
   0x5   : > { %v469_v0 = vld [vmem:[%s3181_s4] sm:$0xff] (!%p316_p2)  ;;  %v470_v1 = vld [vmem:[%s3181_s4 + $0x8] sm:$0xff] (!%p316_p2)  ;;  %s2014_s17 = sshll.u32 (!%p316_p2), %s2598_s10, 5  ;;  %v471_v5 = vld [vmem:[%s3181_s4 + $0x10] sm:$0xff] (!%p316_p2)  ;;  %vm473_vm0 = vcmask (!%p316_p2), 261120   ;;  %s2121_s27 = sshll.u32 (!%p316_p2), %s2598_s10, 8 }
   0x6   : > { %319 = sbr.rel (%p316_p2) target bundleno = 337 (0x151), region = 48  ;;  %v433_v2 = vld [vmem:[%s3180_s3] sm:$0xff] (!%p316_p2)  ;;  %v2432_v3 = vpack.c.bf16 (!%p316_p2), %v470_v1, %v469_v0  ;;  %v434_v4 = vld [vmem:[%s3180_s3 + $0x8] sm:$0xff] (!%p316_p2)  ;;  %v472_v6 = vld [vmem:[%s3181_s4 + $0x18] sm:$0xff] (!%p316_p2)  ;;  %p370_p3 = scmp.lt.s32.totalorder (!%p316_p2), %s2014_s17, 127 }
   0x7   : > { %v2440_v7 = vpack.c.bf16 (!%p316_p2), %v434_v4, %v433_v2  ;;  %v2436_v8 = vpack.c.bf16 (!%p316_p2), %v472_v6, %v471_v5  ;;  %v435_v9 = vld [vmem:[%s3180_s3 + $0x10] sm:$0xff] (!%p316_p2)  ;;  %v436_v10 = vld [vmem:[%s3180_s3 + $0x18] sm:$0xff] (!%p316_p2)  ;;  %v1148_v12 = vld [vmem:[%s3182_s5] sm:$0xff] (!%p316_p2)  ;;  %p393_p4 = scmp.lt.s32.totalorder (!%p316_p2), %s2598_s10, 3 }
   0x8   : > { %2433 = vmatprep.subr.bf16.mxu1 (!%p316_p2), %v2432_v3  ;;  %v2444_v11 = vpack.c.bf16 (!%p316_p2), %v436_v10, %v435_v9  ;;  %v1149_v13 = vld [vmem:[%s3182_s5 + $0x8] sm:$0xff] (!%p316_p2)  ;;  %v1150_v15 = vld [vmem:[%s3182_s5 + $0x10] sm:$0xff] (!%p316_p2)  ;;  %v1151_v18 = vld [vmem:[%s3182_s5 + $0x18] sm:$0xff] (!%p316_p2) }
   0x9   : > { %2441 = vmatprep.subr.bf16.mxu0 (!%p316_p2), %v2440_v7  ;;  %2435 = vmatpush3.bf16.msra.mxu1 (!%p316_p2), %v2432_v3  ;;  %v2448_v14 = vpack.c.bf16 (!%p316_p2), %v1149_v13, %v1148_v12  ;;  %v2452_v22 = vpack.c.bf16 (!%p316_p2), %v1151_v18, %v1150_v15 }
   0xa   : > { %2443 = vmatpush3.bf16.msra.mxu0 (!%p316_p2), %v2440_v7  ;;  %2437 = vmatprep.subr.bf16.mxu1 (!%p316_p2), %v2436_v8 }
   0xb   : > { %2445 = vmatprep.subr.bf16.mxu0 (!%p316_p2), %v2444_v11 }
   0xd   : > { %s3188_s17 = smov (!%p370_p3, %s2014_s17), 127  ;;  %2439 = vmatpush3.bf16.msra.mxu1 %v2436_v8  ;;  %s3190_s10 = smov (!%p393_p4, %s2598_s10), 3 }
   0xe   : > { %s2633_s13 = sshll.u32 %s3188_s17, 3  ;;  %2447 = vmatpush3.bf16.msra.mxu0 %v2444_v11  ;;  %2456 = vmatprep.subr.bf16.mxu1 %v2440_v7 }
   0xf   : > { %s2639_s16 = scalar_lea.vmem %s3178_s1, %s2633_s13  ;;  %s2645_s20 = scalar_lea.vmem %s3177_s0, %s2633_s13  ;;  %2449 = vmatprep.subr.bf16.mxu0 %v2448_v14 }
  0x10   : > { %v437_v16 = vld [vmem:[%s2639_s16] sm:$0xff]  ;;  %v438_v19 = vld [vmem:[%s2639_s16 + $0x8] sm:$0xff]  ;;  %v439_v21 = vld [vmem:[%s2639_s16 + $0x10] sm:$0xff]  ;;  %s2714_s26 = scalar_lea.vmem %s3179_s2, %s2633_s13  ;;  %s2956_s14 = scalar_lea.vmem %s3184_s7, %s2633_s13 }
  0x11   : > { %v401_v17 = vld [vmem:[%s2645_s20] sm:$0xff]  ;;  %2272 = vmatprep.mubr.msk.f32.mxu1 %vm473_vm0, %v437_v16  ;;  %v402_v20 = vld [vmem:[%s2645_s20 + $0x8] sm:$0xff]  ;;  %v403_v23 = vld [vmem:[%s2645_s20 + $0x10] sm:$0xff]  ;;  %s2022_s13 = sshll.u32 %s3190_s10, 3 }
  0x12   : > { %2328 = vmatprep.mubr.msk.f32.mxu0 %vm473_vm0, %v401_v17  ;;  %2273 = vmatmul.mubr.msk.f32.vlgmr.msra.gmra.mrb[0].mxu1 %vm473_vm0, %v438_v19  ;;  %v440_v24 = vld [vmem:[%s2639_s16 + $0x18] sm:$0xff]  ;;  %v441_v26 = vld [vmem:[%s2639_s16 + $0x20] sm:$0xff]  ;;  %v442_v28 = vld [vmem:[%s2639_s16 + $0x28] sm:$0xff]  ;;  %s396_s18 = scalar_lea.vmem %s3185_s8, %s2022_s13  ;;  %s400_s17 = scalar_lea.vmem %s3186_s9, %s2022_s13 }
  0x13   : > { %2329 = vmatmul.mubr.msk.f32.vlgmr.msra.gmra.mrb[0].mxu0 %vm473_vm0, %v402_v20  ;;  %2458 = vmatpush3.bf16.msra.mxu1 %v2440_v7  ;;  %v404_v25 = vld [vmem:[%s2645_s20 + $0x18] sm:$0xff]  ;;  %v405_v27 = vld [vmem:[%s2645_s20 + $0x20] sm:$0xff]  ;;  %v406_v29 = vld [vmem:[%s2645_s20 + $0x28] sm:$0xff] }
  0x14   : > { %2451 = vmatpush3.bf16.msra.mxu0 %v2448_v14  ;;  %2275 = vmatprep.mubr.msk.f32.mxu1 %vm473_vm0, %v439_v21  ;;  %v443_v30 = vld [vmem:[%s2639_s16 + $0x30] sm:$0xff]  ;;  %v444_v32 = vld [vmem:[%s2639_s16 + $0x38] sm:$0xff]  ;;  %v445_v34 = vld [vmem:[%s2639_s16 + $0x40] sm:$0xff] }
  0x15   : > { %2331 = vmatprep.mubr.msk.f32.mxu0 %vm473_vm0, %v403_v23  ;;  %2453 = vmatprep.subr.bf16.mxu0 %v2452_v22  ;;  %v407_v31 = vld [vmem:[%s2645_s20 + $0x30] sm:$0xff]  ;;  %v408_v33 = vld [vmem:[%s2645_s20 + $0x38] sm:$0xff]  ;;  %v409_v35 = vld [vmem:[%s2645_s20 + $0x40] sm:$0xff] }
  0x16   : > { %2276 = vmatmul.mubr.msk.f32.gmra.mrb[2].mxu1 %vm473_vm0, %v440_v24  ;;  %2457 = vmatprep.subr.bf16.mxu1 %v2444_v11  ;;  %v446_v36 = vld [vmem:[%s2639_s16 + $0x48] sm:$0xff]  ;;  %v447_v38 = vld [vmem:[%s2639_s16 + $0x50] sm:$0xff]  ;;  %v448_v40 = vld [vmem:[%s2639_s16 + $0x58] sm:$0xff] }
  0x17   : > { %2332 = vmatmul.mubr.msk.f32.gmra.mrb[2].mxu0 %vm473_vm0, %v404_v25  ;;  %2278 = vmatprep.mubr.msk.f32.mxu1 %vm473_vm0, %v441_v26  ;;  %v410_v37 = vld [vmem:[%s2645_s20 + $0x48] sm:$0xff]  ;;  %v411_v39 = vld [vmem:[%s2645_s20 + $0x50] sm:$0xff]  ;;  %v412_v41 = vld [vmem:[%s2645_s20 + $0x58] sm:$0xff] }
  0x18   : > { %2334 = vmatprep.mubr.msk.f32.mxu0 %vm473_vm0, %v405_v27  ;;  %2455 = vmatpush3.bf16.msra.mxu0 %v2452_v22  ;;  %v449_v42 = vld [vmem:[%s2639_s16 + $0x60] sm:$0xff]  ;;  %v450_v44 = vld [vmem:[%s2639_s16 + $0x68] sm:$0xff]  ;;  %v451_v46 = vld [vmem:[%s2639_s16 + $0x70] sm:$0xff] }
  0x19   : > { %2459 = vmatpush3.bf16.msra.mxu1 %v2444_v11  ;;  %v413_v43 = vld [vmem:[%s2645_s20 + $0x60] sm:$0xff]  ;;  %v414_v45 = vld [vmem:[%s2645_s20 + $0x68] sm:$0xff]  ;;  %v415_v47 = vld [vmem:[%s2645_s20 + $0x70] sm:$0xff] }
  0x1a   : > { %2279 = vmatmul.mubr.msk.f32.gmra.mrb[4].mxu1 %vm473_vm0, %v442_v28  ;;  %v452_v48 = vld [vmem:[%s2639_s16 + $0x78] sm:$0xff]  ;;  %v453_v50 = vld [vmem:[%s2639_s16 + $0x80] sm:$0xff]  ;;  %v454_v52 = vld [vmem:[%s2639_s16 + $0x88] sm:$0xff] }
  0x1b   : > { %2335 = vmatmul.mubr.msk.f32.gmra.mrb[4].mxu0 %vm473_vm0, %v406_v29  ;;  %2281 = vmatprep.mubr.msk.f32.mxu1 %vm473_vm0, %v443_v30  ;;  %v416_v49 = vld [vmem:[%s2645_s20 + $0x78] sm:$0xff]  ;;  %v1116_v51 = vld [vmem:[%s2714_s26] sm:$0xff]  ;;  %v1117_v53 = vld [vmem:[%s2714_s26 + $0x8] sm:$0xff] }
  0x1c   : > { %2337 = vmatprep.mubr.msk.f32.mxu0 %vm473_vm0, %v407_v31  ;;  %v455_v54 = vld [vmem:[%s2639_s16 + $0x90] sm:$0xff]  ;;  %v456_v56 = vld [vmem:[%s2639_s16 + $0x98] sm:$0xff]  ;;  %v457_v58 = vld [vmem:[%s2639_s16 + $0xa0] sm:$0xff] }
  0x1d   : > { %v1118_v55 = vld [vmem:[%s2714_s26 + $0x10] sm:$0xff]  ;;  %v1119_v57 = vld [vmem:[%s2714_s26 + $0x18] sm:$0xff]  ;;  %v1120_v59 = vld [vmem:[%s2714_s26 + $0x20] sm:$0xff] }
  0x1e   : > { %2282 = vmatmul.mubr.msk.f32.gmra.mrb[6].mxu1 %vm473_vm0, %v444_v32  ;;  %v458_v60 = vld [vmem:[%s2639_s16 + $0xa8] sm:$0xff]  ;;  %v459_v62 = vld [vmem:[%s2639_s16 + $0xb0] sm:$0xff]  ;;  %v460_v0 = vld [vmem:[%s2639_s16 + $0xb8] sm:$0xff] }
  0x1f   : > { %2338 = vmatmul.mubr.msk.f32.gmra.mrb[6].mxu0 %vm473_vm0, %v408_v33  ;;  %2284 = vmatprep.mubr.msk.f32.mxu1 %vm473_vm0, %v445_v34  ;;  %v1121_v61 = vld [vmem:[%s2714_s26 + $0x28] sm:$0xff]  ;;  %v1122_v63 = vld [vmem:[%s2714_s26 + $0x30] sm:$0xff]  ;;  %v1123_v1 = vld [vmem:[%s2714_s26 + $0x38] sm:$0xff] }
  0x20   : > { %2340 = vmatprep.mubr.msk.f32.mxu0 %vm473_vm0, %v409_v35  ;;  %v461_v2 = vld [vmem:[%s2639_s16 + $0xc0] sm:$0xff]  ;;  %v462_v4 = vld [vmem:[%s2639_s16 + $0xc8] sm:$0xff]  ;;  %v463_v6 = vld [vmem:[%s2639_s16 + $0xd0] sm:$0xff] }
  0x21   : > { %v1124_v3 = vld [vmem:[%s2714_s26 + $0x40] sm:$0xff]  ;;  %v1125_v5 = vld [vmem:[%s2714_s26 + $0x48] sm:$0xff]  ;;  %v1126_v7 = vld [vmem:[%s2714_s26 + $0x50] sm:$0xff] }
  0x22   : > { %2285 = vmatmul.mubr.msk.f32.gmra.mrb[8].mxu1 %vm473_vm0, %v446_v36  ;;  %v464_v8 = vld [vmem:[%s2639_s16 + $0xd8] sm:$0xff]  ;;  %v465_v10 = vld [vmem:[%s2639_s16 + $0xe0] sm:$0xff]  ;;  %v466_v12 = vld [vmem:[%s2639_s16 + $0xe8] sm:$0xff] }
  0x23   : > { %2341 = vmatmul.mubr.msk.f32.gmra.mrb[8].mxu0 %vm473_vm0, %v410_v37  ;;  %2287 = vmatprep.mubr.msk.f32.mxu1 %vm473_vm0, %v447_v38  ;;  %v1127_v9 = vld [vmem:[%s2714_s26 + $0x58] sm:$0xff]  ;;  %v1128_v11 = vld [vmem:[%s2714_s26 + $0x60] sm:$0xff]  ;;  %v1129_v13 = vld [vmem:[%s2714_s26 + $0x68] sm:$0xff] }
  0x24   : > { %2343 = vmatprep.mubr.msk.f32.mxu0 %vm473_vm0, %v411_v39  ;;  %v467_v14 = vld [vmem:[%s2639_s16 + $0xf0] sm:$0xff]  ;;  %v468_v16 = vld [vmem:[%s2639_s16 + $0xf8] sm:$0xff]  ;;  %v417_v18 = vld [vmem:[%s2645_s20 + $0x80] sm:$0xff] }
  0x25   : > { %v1130_v15 = vld [vmem:[%s2714_s26 + $0x70] sm:$0xff]  ;;  %v1131_v17 = vld [vmem:[%s2714_s26 + $0x78] sm:$0xff]  ;;  %v1132_v19 = vld [vmem:[%s2714_s26 + $0x80] sm:$0xff] }
  0x26   : > { %2288 = vmatmul.mubr.msk.f32.gmra.mrb[10].mxu1 %vm473_vm0, %v448_v40  ;;  %v418_v20 = vld [vmem:[%s2645_s20 + $0x88] sm:$0xff]  ;;  %v419_v22 = vld [vmem:[%s2645_s20 + $0x90] sm:$0xff]  ;;  %v420_v24 = vld [vmem:[%s2645_s20 + $0x98] sm:$0xff] }
  0x27   : > { %2344 = vmatmul.mubr.msk.f32.gmra.mrb[10].mxu0 %vm473_vm0, %v412_v41  ;;  %2290 = vmatprep.mubr.msk.f32.mxu1 %vm473_vm0, %v449_v42  ;;  %v1133_v21 = vld [vmem:[%s2714_s26 + $0x88] sm:$0xff]  ;;  %v1134_v23 = vld [vmem:[%s2714_s26 + $0x90] sm:$0xff]  ;;  %v1135_v25 = vld [vmem:[%s2714_s26 + $0x98] sm:$0xff] }
  0x28   : > { %2346 = vmatprep.mubr.msk.f32.mxu0 %vm473_vm0, %v413_v43  ;;  %v421_v26 = vld [vmem:[%s2645_s20 + $0xa0] sm:$0xff]  ;;  %v422_v28 = vld [vmem:[%s2645_s20 + $0xa8] sm:$0xff]  ;;  %v423_v30 = vld [vmem:[%s2645_s20 + $0xb0] sm:$0xff] }
  0x29   : > { %v1136_v27 = vld [vmem:[%s2714_s26 + $0xa0] sm:$0xff]  ;;  %v1137_v29 = vld [vmem:[%s2714_s26 + $0xa8] sm:$0xff]  ;;  %v1138_v31 = vld [vmem:[%s2714_s26 + $0xb0] sm:$0xff] }
  0x2a   : > { %2291 = vmatmul.mubr.msk.f32.gmra.mrb[12].mxu1 %vm473_vm0, %v450_v44  ;;  %v424_v32 = vld [vmem:[%s2645_s20 + $0xb8] sm:$0xff]  ;;  %v425_v34 = vld [vmem:[%s2645_s20 + $0xc0] sm:$0xff]  ;;  %v426_v36 = vld [vmem:[%s2645_s20 + $0xc8] sm:$0xff] }
  0x2b   : > { %2347 = vmatmul.mubr.msk.f32.gmra.mrb[12].mxu0 %vm473_vm0, %v414_v45  ;;  %2293 = vmatprep.mubr.msk.f32.mxu1 %vm473_vm0, %v451_v46  ;;  %v1139_v33 = vld [vmem:[%s2714_s26 + $0xb8] sm:$0xff]  ;;  %v1140_v35 = vld [vmem:[%s2714_s26 + $0xc0] sm:$0xff]  ;;  %v1141_v37 = vld [vmem:[%s2714_s26 + $0xc8] sm:$0xff] }
  0x2c   : > { %2349 = vmatprep.mubr.msk.f32.mxu0 %vm473_vm0, %v415_v47  ;;  %v427_v38 = vld [vmem:[%s2645_s20 + $0xd0] sm:$0xff]  ;;  %v428_v40 = vld [vmem:[%s2645_s20 + $0xd8] sm:$0xff]  ;;  %v429_v42 = vld [vmem:[%s2645_s20 + $0xe0] sm:$0xff] }
  0x2d   : > { %v1142_v39 = vld [vmem:[%s2714_s26 + $0xd0] sm:$0xff]  ;;  %v1143_v41 = vld [vmem:[%s2714_s26 + $0xd8] sm:$0xff]  ;;  %v1144_v43 = vld [vmem:[%s2714_s26 + $0xe0] sm:$0xff] }
  0x2e   : > { %2294 = vmatmul.mubr.msk.f32.gmra.mrb[14].mxu1 %vm473_vm0, %v452_v48  ;;  %v430_v44 = vld [vmem:[%s2645_s20 + $0xe8] sm:$0xff]  ;;  %v431_v46 = vld [vmem:[%s2645_s20 + $0xf0] sm:$0xff]  ;;  %v432_v48 = vld [vmem:[%s2645_s20 + $0xf8] sm:$0xff] }
  0x2f   : > { %2350 = vmatmul.mubr.msk.f32.gmra.mrb[14].mxu0 %vm473_vm0, %v416_v49  ;;  %2296 = vmatprep.mubr.msk.f32.mxu1 %vm473_vm0, %v453_v50  ;;  %v1145_v45 = vld [vmem:[%s2714_s26 + $0xe8] sm:$0xff]  ;;  %v1146_v47 = vld [vmem:[%s2714_s26 + $0xf0] sm:$0xff]  ;;  %v1147_v49 = vld [vmem:[%s2714_s26 + $0xf8] sm:$0xff] }
  0x30   : > { %2384 = vmatprep.mubr.msk.f32.mxu0 %vm473_vm0, %v1116_v51 }
  0x32   : > { %2297 = vmatmul.mubr.msk.f32.gmra.mrb[16].mxu1 %vm473_vm0, %v454_v52 }
  0x33   : > { %2385 = vmatmul.mubr.msk.f32.vlgmr.msra.gmra.mrb[0].mxu0 %vm473_vm0, %v1117_v53  ;;  %2299 = vmatprep.mubr.msk.f32.mxu1 %vm473_vm0, %v455_v54  ;;  %v1577_v54 = vlaneseq }
  0x34   : > { %2387 = vmatprep.mubr.msk.f32.mxu0 %vm473_vm0, %v1118_v55 }
  0x36   : > { %2300 = vmatmul.mubr.msk.f32.gmra.mrb[18].mxu1 %vm473_vm0, %v456_v56 }
  0x37   : > { %2388 = vmatmul.mubr.msk.f32.gmra.mrb[2].mxu0 %vm473_vm0, %v1119_v57  ;;  %2302 = vmatprep.mubr.msk.f32.mxu1 %vm473_vm0, %v457_v58  ;;  %v2863_v57 = vshrl.u32 %v1577_v54, 7 }
  0x38   : > { %2390 = vmatprep.mubr.msk.f32.mxu0 %vm473_vm0, %v1120_v59 }
  0x3a   : > { %2303 = vmatmul.mubr.msk.f32.gmra.mrb[20].mxu1 %vm473_vm0, %v458_v60  ;;  %v1579_v60 = vadd.s32 8, %v2863_v57 }
  0x3b   : > { %2391 = vmatmul.mubr.msk.f32.gmra.mrb[4].mxu0 %vm473_vm0, %v1121_v61  ;;  %2305 = vmatprep.mubr.msk.f32.mxu1 %vm473_vm0, %v459_v62  ;;  %v2873_v62 = vstv %s2121_s27 }
  0x3c   : > { %2393 = vmatprep.mubr.msk.f32.mxu0 %vm473_vm0, %v1122_v63  ;;  %v1581_v63 = vadd.s32 24, %v2863_v57 }
  0x3e   : > { %2306 = vmatmul.mubr.msk.f32.gmra.mrb[22].mxu1 %vm473_vm0, %v460_v0 }
  0x3f   : > { %2394 = vmatmul.mubr.msk.f32.gmra.mrb[6].mxu0 %vm473_vm0, %v1123_v1  ;;  %2308 = vmatprep.mubr.msk.f32.mxu1 %vm473_vm0, %v461_v2  ;;  %v1612_v1 = vadd.s32 %v2873_v62, %v1579_v60  ;;  %v1611_v2 = vadd.s32 %v2873_v62, %v2863_v57 }
  0x40   : > { %2396 = vmatprep.mubr.msk.f32.mxu0 %vm473_vm0, %v1124_v3  ;;  %v1580_v3 = vadd.s32 16, %v2863_v57 }
  0x41   : > { %vm1644_vm1 = vcmp.lt.s32.totalorder %v1612_v1, 1000  ;;  %vm1643_vm2 = vcmp.lt.s32.totalorder %v1611_v2, 1000 }
  0x42   : > { %2309 = vmatmul.mubr.msk.f32.gmra.mrb[24].mxu1 %vm473_vm0, %v462_v4 }
  0x43   : > { %2397 = vmatmul.mubr.msk.f32.gmra.mrb[8].mxu0 %vm473_vm0, %v1125_v5  ;;  %2311 = vmatprep.mubr.msk.f32.mxu1 %vm473_vm0, %v463_v6  ;;  %v1614_v5 = vadd.s32 %v2873_v62, %v1581_v63  ;;  %v1583_v6 = vadd.s32 40, %v2863_v57 }
  0x44   : > { %2399 = vmatprep.mubr.msk.f32.mxu0 %vm473_vm0, %v1126_v7  ;;  %v1582_v7 = vadd.s32 32, %v2863_v57 }
  0x45   : > { %vm1646_vm3 = vcmp.lt.s32.totalorder %v1614_v5, 1000 }
  0x46   : > { %2312 = vmatmul.mubr.msk.f32.gmra.mrb[26].mxu1 %vm473_vm0, %v464_v8 }
  0x47   : > { %2400 = vmatmul.mubr.msk.f32.gmra.mrb[10].mxu0 %vm473_vm0, %v1127_v9  ;;  %2314 = vmatprep.mubr.msk.f32.mxu1 %vm473_vm0, %v465_v10  ;;  %v1585_v9 = vadd.s32 56, %v2863_v57  ;;  %v1584_v10 = vadd.s32 48, %v2863_v57 }
  0x48   : > { %2402 = vmatprep.mubr.msk.f32.mxu0 %vm473_vm0, %v1128_v11  ;;  %v1587_v11 = vadd.s32 72, %v2863_v57 }
  0x4a   : > { %2315 = vmatmul.mubr.msk.f32.gmra.mrb[28].mxu1 %vm473_vm0, %v466_v12  ;;  %v1613_v12 = vadd.s32 %v2873_v62, %v1580_v3 }
  0x4b   : > { %2403 = vmatmul.mubr.msk.f32.gmra.mrb[12].mxu0 %vm473_vm0, %v1129_v13  ;;  %2317 = vmatprep.mubr.msk.f32.mxu1 %vm473_vm0, %v467_v14  ;;  %v1616_v14 = vadd.s32 %v2873_v62, %v1583_v6  ;;  %v1597_v6 = vadd.s32 152, %v2863_v57 }
  0x4c   : > { %2405 = vmatprep.mubr.msk.f32.mxu0 %vm473_vm0, %v1130_v15  ;;  %v1615_v15 = vadd.s32 %v2873_v62, %v1582_v7  ;;  %vm1645_vm4 = vcmp.lt.s32.totalorder %v1613_v12, 1000 }
  0x4d   : > { %vm1648_vm5 = vcmp.lt.s32.totalorder %v1616_v14, 1000 }
  0x4e   : > { %2318 = vmatmul.mubr.msk.f32.gmra.mrb[30].mxu1 %vm473_vm0, %v468_v16  ;;  %v1586_v16 = vadd.s32 64, %v2863_v57  ;;  %vm1647_vm6 = vcmp.lt.s32.totalorder %v1615_v15, 1000 }
  0x4f   : > { %2406 = vmatmul.mubr.msk.f32.gmra.mrb[14].mxu0 %vm473_vm0, %v1131_v17  ;;  %2352 = vmatprep.mubr.msk.f32.mxu1 %vm473_vm0, %v417_v18  ;;  %v1618_v18 = vadd.s32 %v2873_v62, %v1585_v9 }
  0x50   : > { %2408 = vmatprep.mubr.msk.f32.mxu0 %vm473_vm0, %v1132_v19  ;;  %v1617_v19 = vadd.s32 %v2873_v62, %v1584_v10 }
  0x51   : > { %vm1650_vm7 = vcmp.lt.s32.totalorder %v1618_v18, 1000 }
  0x52   : > { %2353 = vmatmul.mubr.msk.f32.vlgmr.msra.gmra.mrb[16].mxu1 %vm473_vm0, %v418_v20  ;;  %v1589_v20 = vadd.s32 88, %v2863_v57  ;;  %vm1649_vm8 = vcmp.lt.s32.totalorder %v1617_v19, 1000 }
  0x53   : > { %2409 = vmatmul.mubr.msk.f32.gmra.mrb[16].mxu0 %vm473_vm0, %v1133_v21  ;;  %2355 = vmatprep.mubr.msk.f32.mxu1 %vm473_vm0, %v419_v22  ;;  %v1588_v21 = vadd.s32 80, %v2863_v57  ;;  %v1620_v22 = vadd.s32 %v2873_v62, %v1587_v11  ;;  %v1596_v11 = vadd.s32 144, %v2863_v57 }
  0x54   : > { %2411 = vmatprep.mubr.msk.f32.mxu0 %vm473_vm0, %v1134_v23  ;;  %v1591_v23 = vadd.s32 104, %v2863_v57 }
  0x55   : > { %vm1652_vm9 = vcmp.lt.s32.totalorder %v1620_v22, 1000 }
  0x56   : > { %2356 = vmatmul.mubr.msk.f32.gmra.mrb[18].mxu1 %vm473_vm0, %v420_v24  ;;  %v2541_v24 = vmov 0.0  }
  0x57   : > { %2412 = vmatmul.mubr.msk.f32.gmra.mrb[18].mxu0 %vm473_vm0, %v1135_v25  ;;  %2358 = vmatprep.mubr.msk.f32.mxu1 %vm473_vm0, %v421_v26  ;;  %v2123_v25 = vsel %vm1644_vm1, 1.0, %v2541_v24  ;;  %v2122_v26 = vsel %vm1643_vm2, 1.0, %v2541_v24 }
  0x58   : > { %2414 = vmatprep.mubr.msk.f32.mxu0 %vm473_vm0, %v1136_v27  ;;  %v2911_v27 = vsel %vm1646_vm3, 1.0, %v2541_v24 }
  0x5a   : > { %2359 = vmatmul.mubr.msk.f32.gmra.mrb[20].mxu1 %vm473_vm0, %v422_v28 }
  0x5b   : > { %2415 = vmatmul.mubr.msk.f32.gmra.mrb[20].mxu0 %vm473_vm0, %v1137_v29  ;;  %2361 = vmatprep.mubr.msk.f32.mxu1 %vm473_vm0, %v423_v30  ;;  %v1619_v29 = vadd.s32 %v2873_v62, %v1586_v16 }
  0x5c   : > { %2417 = vmatprep.mubr.msk.f32.mxu0 %vm473_vm0, %v1138_v31  ;;  %v1622_v31 = vadd.s32 %v2873_v62, %v1589_v20 }
  0x5d   : > { %vm1651_vm10 = vcmp.lt.s32.totalorder %v1619_v29, 1000  ;;  %v1629_v29 = vadd.s32 %v2873_v62, %v1596_v11 }
  0x5e   : > { %2362 = vmatmul.mubr.msk.f32.gmra.mrb[22].mxu1 %vm473_vm0, %v424_v32  ;;  %v1621_v32 = vadd.s32 %v2873_v62, %v1588_v21  ;;  %vm1654_vm11 = vcmp.lt.s32.totalorder %v1622_v31, 1000  ;;  %v2960_v63 = vsel %vm1651_vm10, 1.0, %v2541_v24  ;;  %v1630_v21 = vadd.s32 %v2873_v62, %v1597_v6 }
  0x5f   : > { %2418 = vmatmul.mubr.msk.f32.gmra.mrb[22].mxu0 %vm473_vm0, %v1139_v33  ;;  %2364 = vmatprep.mubr.msk.f32.mxu1 %vm473_vm0, %v425_v34  ;;  %v1624_v33 = vadd.s32 %v2873_v62, %v1591_v23  ;;  %v1590_v34 = vadd.s32 96, %v2863_v57  ;;  %v2966_v3 = vsel %vm1654_vm11, 1.0, %v2541_v24 }
  0x60   : > { %2420 = vmatprep.mubr.msk.f32.mxu0 %vm473_vm0, %v1140_v35  ;;  %v1593_v35 = vadd.s32 120, %v2863_v57  ;;  %vm1653_vm12 = vcmp.lt.s32.totalorder %v1621_v32, 1000  ;;  %vm1662_vm3 = vcmp.lt.s32.totalorder %v1630_v21, 1000 }
  0x61   : > { %vm1656_vm13 = vcmp.lt.s32.totalorder %v1624_v33, 1000  ;;  %v2973_v9 = vsel %vm1653_vm12, 1.0, %v2541_v24 }
  0x62   : > { %2365 = vmatmul.mubr.msk.f32.gmra.mrb[24].mxu1 %vm473_vm0, %v426_v36  ;;  %v2124_v36 = vsel %vm1645_vm4, 1.0, %v2541_v24  ;;  %v1626_v54 = vadd.s32 %v2873_v62, %v1593_v35  ;;  %v2976_v10 = vsel %vm1656_vm13, 1.0, %v2541_v24  ;;  %vm1661_vm4 = vcmp.lt.s32.totalorder %v1629_v29, 1000 }
  0x63   : > { %2421 = vmatmul.mubr.msk.f32.gmra.mrb[24].mxu0 %vm473_vm0, %v1141_v37  ;;  %2367 = vmatprep.mubr.msk.f32.mxu1 %vm473_vm0, %v427_v38  ;;  %v2925_v37 = vsel %vm1648_vm5, 1.0, %v2541_v24  ;;  %v1592_v38 = vadd.s32 112, %v2863_v57 }
  0x64   : > { %2423 = vmatprep.mubr.msk.f32.mxu0 %vm473_vm0, %v1142_v39  ;;  %v1595_v39 = vadd.s32 136, %v2863_v57  ;;  %vm1658_vm15 = vcmp.lt.s32.totalorder %v1626_v54, 1000 }
  0x65   : > { %v1625_v1 = vadd.s32 %v2873_v62, %v1592_v38  ;;  %v2996_v33 = vsel %vm1658_vm15, 1.0, %v2541_v24 }
  0x66   : > { %2368 = vmatmul.mubr.msk.f32.gmra.mrb[26].mxu1 %vm473_vm0, %v428_v40  ;;  %v2932_v40 = vld [vmem:[%s3183_s6] ss:$0 sm:$0xff] }
  0x67   : > { %2424 = vmatmul.mubr.msk.f32.gmra.mrb[26].mxu0 %vm473_vm0, %v1143_v41  ;;  %2370 = vmatprep.mubr.msk.f32.mxu1 %vm473_vm0, %v429_v42  ;;  %v2936_v41 = vsel %vm1647_vm6, 1.0, %v2541_v24  ;;  %v2939_v42 = vsel %vm1650_vm7, 1.0, %v2541_v24 }
  0x68   : > { %2426 = vmatprep.mubr.msk.f32.mxu0 %vm473_vm0, %v1144_v43  ;;  %v1594_v43 = vadd.s32 128, %v2863_v57 }
  0x6a   : > { %2371 = vmatmul.mubr.msk.f32.gmra.mrb[28].mxu1 %vm473_vm0, %v430_v44  ;;  %v1627_v5 = vadd.s32 %v2873_v62, %v1594_v43 }
  0x6b   : > { %2427 = vmatmul.mubr.msk.f32.gmra.mrb[28].mxu0 %vm473_vm0, %v1145_v45  ;;  %2373 = vmatprep.mubr.msk.f32.mxu1 %vm473_vm0, %v431_v46  ;;  %v2944_v45 = vsel %vm1649_vm8, 1.0, %v2541_v24  ;;  %v2947_v46 = vsel %vm1652_vm9, 1.0, %v2541_v24 }
  0x6c   : > { %2429 = vmatprep.mubr.msk.f32.mxu0 %vm473_vm0, %v1146_v47  ;;  %vm1659_vm2 = vcmp.lt.s32.totalorder %v1627_v5, 1000 }
  0x6d   : > { %v3011_v43 = vsel %vm1659_vm2, 1.0, %v2541_v24 }
  0x6e   : > { %2374 = vmatmul.mubr.msk.f32.gmra.mrb[30].mxu1 %vm473_vm0, %v432_v48 }
  0x6f   : > { %2430 = vmatmul.mubr.msk.f32.gmra.mrb[30].mxu0 %vm473_vm0, %v1147_v49  ;;  %v1623_v49 = vadd.s32 %v2873_v62, %v1590_v34  ;;  %vm1657_vm0 = vcmp.lt.s32.totalorder %v1625_v1, 1000  ;;  %v1599_v1 = vadd.s32 168, %v2863_v57 }
  0x71   : > { %vm1655_vm14 = vcmp.lt.s32.totalorder %v1623_v49, 1000 }
  0x72   : > { %v2992_v32 = vsel %vm1655_vm14, 1.0, %v2541_v24 }
  0xe5   : > { %v2851_v50 = vpop.f32.mrb[0].mxu1 }
  0xe6   : > { %v2853_v51 = vpop.f32.mrb[1].mxu1 }
  0xe9   : > { %v2855_v52 = vpop.f32.mrb[2].mxu1 }
  0xea   : > { %v2857_v53 = vpop.f32.mrb[3].mxu1 }
  0xed   : > { %v2859_v55 = vpop.f32.mrb[4].mxu1 }
  0xee   : > { %v2861_v56 = vpop.f32.mrb[5].mxu1 }
  0xf1   : > { %v2865_v58 = vpop.f32.mrb[6].mxu1 }
  0xf2   : > { %v2867_v59 = vpop.f32.mrb[7].mxu1 }
  0xf5   : > { %v2871_v61 = vpop.f32.mrb[8].mxu1 }
  0xf6   : > { %v2876_v0 = vpop.f32.mrb[9].mxu1 }
  0xf9   : > { %v2882_v4 = vpop.f32.mrb[10].mxu1 }
  0xfa   : > { %v2887_v8 = vpop.f32.mrb[11].mxu1 }
  0xfd   : > { %v2893_v13 = vpop.f32.mrb[12].mxu1 }
  0xfe   : > { %v2898_v17 = vpop.f32.mrb[13].mxu1 }
 0x101   : > { %v2913_v28 = vpop.f32.mrb[14].mxu1 }
 0x102   : > { %v2916_v30 = vpop.f32.mrb[15].mxu1 }
 0x106   : > { %v2386_v44 = vpop.f32.mrb[0].mxu0 }
 0x107   : > { %v2460_v47 = vadd.f32 %v2386_v44, %v2851_v50  ;;  %v1314_v48 = vpop.f32.mrb[1].mxu0  ;;  %v1628_v50 = vadd.s32 %v2873_v62, %v1595_v39 }
 0x108   : > { %v2461_v60 = vadd.f32 %v1314_v48, %v2853_v51 }
 0x109   : > { %v1513_v2 = vadd.f32 %v2460_v47, %v2932_v40  ;;  %vm1660_vm1 = vcmp.lt.s32.totalorder %v1628_v50, 1000 }
 0x10a   : > { %v1512_v7 = vadd.f32 %v2461_v60, %v2932_v40  ;;  %v2389_v51 = vpop.f32.mrb[2].mxu0  ;;  %v3007_v39 = vsel %vm1660_vm1, 1.0, %v2541_v24 }
 0x10b   : > { %1545 = vst [vmem:[%s2956_s14 + $0x8] sm:$0xff] %v1513_v2  ;;  %v1740_v12 = vmul.f32 %v2123_v25, %v1513_v2  ;;  %v2462_v14 = vadd.f32 %v2389_v51, %v2855_v52  ;;  %v1324_v15 = vpop.f32.mrb[3].mxu0  ;;  %v3024_v51 = vsel %vm1662_vm3, 1.0, %v2541_v24 }
 0x10c   : > { %1544 = vst [vmem:[%s2956_s14] sm:$0xff] %v1512_v7  ;;  %v1739_v16 = vmul.f32 %v2122_v26, %v1512_v7  ;;  %v2463_v18 = vadd.f32 %v1324_v15, %v2857_v53 }
 0x10d   : > { %v1804_v19 = vmul.f32 %v1740_v12, %v1513_v2  ;;  %v1515_v20 = vadd.f32 %v2462_v14, %v2932_v40 }
 0x10e   : > { %v1771_v22 = vadd.f32 %v1740_v12, %v1739_v16  ;;  %v1803_v23 = vmul.f32 %v1739_v16, %v1512_v7  ;;  %v1514_v52 = vadd.f32 %v2463_v18, %v2932_v40  ;;  %v2392_v25 = vpop.f32.mrb[4].mxu0 }
 0x10f   : > { %1547 = vst [vmem:[%s2956_s14 + $0x18] sm:$0xff] %v1515_v20  ;;  %v1742_v26 = vmul.f32 %v2911_v27, %v1515_v20  ;;  %v2464_v53 = vadd.f32 %v2392_v25, %v2859_v55  ;;  %v1334_v31 = vpop.f32.mrb[5].mxu0  ;;  %v3002_v27 = vsel %vm1657_vm0, 1.0, %v2541_v24 }
 0x110   : > { %v1835_v34 = vadd.f32 %v1804_v19, %v1803_v23  ;;  %1546 = vst [vmem:[%s2956_s14 + $0x10] sm:$0xff] %v1514_v52  ;;  %v1741_v35 = vmul.f32 %v2124_v36, %v1514_v52  ;;  %v2465_v38 = vadd.f32 %v1334_v31, %v2861_v56 }
 0x111   : > { %v1517_v55 = vadd.f32 %v2464_v53, %v2932_v40  ;;  %v1806_v48 = vmul.f32 %v1742_v26, %v1515_v20  ;;  %v1632_v20 = vadd.s32 %v2873_v62, %v1599_v1 }
 0x112   : > { %v1772_v44 = vadd.f32 %v1771_v22, %v1741_v35  ;;  %v1805_v36 = vmul.f32 %v1741_v35, %v1514_v52  ;;  %v1516_v56 = vadd.f32 %v2465_v38, %v2932_v40  ;;  %v2395_v47 = vpop.f32.mrb[6].mxu0 }
 0x113   : > { %1549 = vst [vmem:[%s2956_s14 + $0x28] sm:$0xff] %v1517_v55  ;;  %v1744_v49 = vmul.f32 %v2925_v37, %v1517_v55  ;;  %v2466_v54 = vadd.f32 %v2395_v47, %v2865_v58  ;;  %v1344_v60 = vpop.f32.mrb[7].mxu0  ;;  %v3027_v58 = vsel %vm1661_vm4, 1.0, %v2541_v24  ;;  %v1598_v37 = vadd.s32 160, %v2863_v57 }
 0x114   : > { %v1836_v50 = vadd.f32 %v1835_v34, %v1805_v36  ;;  %1548 = vst [vmem:[%s2956_s14 + $0x20] sm:$0xff] %v1516_v56  ;;  %v1743_v2 = vmul.f32 %v2936_v41, %v1516_v56  ;;  %v1773_v5 = vadd.f32 %v1772_v44, %v1742_v26  ;;  %v2467_v6 = vadd.f32 %v1344_v60, %v2867_v59 }
 0x115   : > { %v1519_v7 = vadd.f32 %v2466_v54, %v2932_v40  ;;  %v1808_v16 = vmul.f32 %v1744_v49, %v1517_v55  ;;  %v1631_v29 = vadd.s32 %v2873_v62, %v1598_v37  ;;  %vm1664_vm5 = vcmp.lt.s32.totalorder %v1632_v20, 1000 }
 0x116   : > { %v1774_v11 = vadd.f32 %v1773_v5, %v1743_v2  ;;  %v1807_v12 = vmul.f32 %v1743_v2, %v1516_v56  ;;  %v1837_v14 = vadd.f32 %v1836_v50, %v1806_v48  ;;  %v1518_v41 = vadd.f32 %v2467_v6, %v2932_v40  ;;  %v2398_v15 = vpop.f32.mrb[8].mxu0 }
 0x117   : > { %1551 = vst [vmem:[%s2956_s14 + $0x38] sm:$0xff] %v1519_v7  ;;  %v1746_v59 = vmul.f32 %v2939_v42, %v1519_v7  ;;  %v2468_v18 = vadd.f32 %v2398_v15, %v2871_v61  ;;  %v1354_v19 = vpop.f32.mrb[9].mxu0  ;;  %v1601_v42 = vadd.s32 184, %v2863_v57  ;;  %v1600_v61 = vadd.s32 176, %v2863_v57 }
 0x118   : > { %v1838_v21 = vadd.f32 %v1837_v14, %v1807_v12  ;;  %1550 = vst [vmem:[%s2956_s14 + $0x30] sm:$0xff] %v1518_v41  ;;  %v1745_v22 = vmul.f32 %v2944_v45, %v1518_v41  ;;  %v1775_v23 = vadd.f32 %v1774_v11, %v1744_v49  ;;  %v2469_v52 = vadd.f32 %v1354_v19, %v2876_v0 }
 0x119   : > { %v1521_v25 = vadd.f32 %v2468_v18, %v2932_v40  ;;  %v1810_v38 = vmul.f32 %v1746_v59, %v1519_v7  ;;  %vm1663_vm6 = vcmp.lt.s32.totalorder %v1631_v29, 1000  ;;  %v1634_v49 = vadd.s32 %v2873_v62, %v1601_v42 }
 0x11a   : > { %v1776_v26 = vadd.f32 %v1775_v23, %v1745_v22  ;;  %v1809_v53 = vmul.f32 %v1745_v22, %v1518_v41  ;;  %v1839_v31 = vadd.f32 %v1838_v21, %v1808_v16  ;;  %v1520_v34 = vadd.f32 %v2469_v52, %v2932_v40  ;;  %v2401_v35 = vpop.f32.mrb[10].mxu0 }
 0x11b   : > { %1553 = vst [vmem:[%s2956_s14 + $0x48] sm:$0xff] %v1521_v25  ;;  %v1748_v45 = vmul.f32 %v2947_v46, %v1521_v25  ;;  %v2470_v0 = vadd.f32 %v2401_v35, %v2882_v4  ;;  %v1364_v55 = vpop.f32.mrb[11].mxu0  ;;  %v1633_v46 = vadd.s32 %v2873_v62, %v1600_v61  ;;  %v3058_v6 = vsel %vm1664_vm5, 1.0, %v2541_v24 }
 0x11c   : > { %v1840_v44 = vadd.f32 %v1839_v31, %v1809_v53  ;;  %1552 = vst [vmem:[%s2956_s14 + $0x40] sm:$0xff] %v1520_v34  ;;  %v1747_v36 = vmul.f32 %v2960_v63, %v1520_v34  ;;  %v1777_v56 = vadd.f32 %v1776_v26, %v1746_v59  ;;  %v2471_v47 = vadd.f32 %v1364_v55, %v2887_v8 }
 0x11d   : > { %v1523_v48 = vadd.f32 %v2470_v0, %v2932_v40  ;;  %v1812_v2 = vmul.f32 %v1748_v45, %v1521_v25  ;;  %vm1666_vm7 = vcmp.lt.s32.totalorder %v1634_v49, 1000  ;;  %vm1665_vm8 = vcmp.lt.s32.totalorder %v1633_v46, 1000 }
 0x11e   : > { %v1778_v54 = vadd.f32 %v1777_v56, %v1747_v36  ;;  %v1811_v4 = vmul.f32 %v1747_v36, %v1520_v34  ;;  %v1841_v60 = vadd.f32 %v1840_v44, %v1810_v38  ;;  %v1522_v1 = vadd.f32 %v2471_v47, %v2932_v40  ;;  %v2404_v50 = vpop.f32.mrb[12].mxu0 }
 0x11f   : > { %1555 = vst [vmem:[%s2956_s14 + $0x58] sm:$0xff] %v1523_v48  ;;  %v1750_v63 = vmul.f32 %v2966_v3, %v1523_v48  ;;  %v2472_v8 = vadd.f32 %v2404_v50, %v2893_v13  ;;  %v1374_v5 = vpop.f32.mrb[13].mxu0  ;;  %v3066_v3 = vsel %vm1663_vm6, 1.0, %v2541_v24  ;;  %v1603_v20 = vadd.s32 200, %v2863_v57 }
 0x120   : > { %v1842_v7 = vadd.f32 %v1841_v60, %v1811_v4  ;;  %1554 = vst [vmem:[%s2956_s14 + $0x50] sm:$0xff] %v1522_v1  ;;  %v1749_v37 = vmul.f32 %v2973_v9, %v1522_v1  ;;  %v1779_v11 = vadd.f32 %v1778_v54, %v1748_v45  ;;  %v2473_v12 = vadd.f32 %v1374_v5, %v2898_v17 }
 0x121   : > { %v1525_v14 = vadd.f32 %v2472_v8, %v2932_v40  ;;  %v1814_v18 = vmul.f32 %v1750_v63, %v1523_v48  ;;  %v3079_v42 = vsel %vm1666_vm7, 1.0, %v2541_v24  ;;  %v1636_v0 = vadd.s32 %v2873_v62, %v1603_v20 }
 0x122   : > { %v1780_v13 = vadd.f32 %v1779_v11, %v1749_v37  ;;  %v1813_v41 = vmul.f32 %v1749_v37, %v1522_v1  ;;  %v1843_v15 = vadd.f32 %v1842_v7, %v1812_v2  ;;  %v1524_v16 = vadd.f32 %v2473_v12, %v2932_v40  ;;  %v2407_v59 = vpop.f32.mrb[14].mxu0 }
 0x123   : > { %1557 = vst [vmem:[%s2956_s14 + $0x68] sm:$0xff] %v1525_v14  ;;  %v1752_v9 = vmul.f32 %v2976_v10, %v1525_v14  ;;  %v2474_v17 = vadd.f32 %v2407_v59, %v2913_v28  ;;  %v1384_v19 = vpop.f32.mrb[15].mxu0  ;;  %v3083_v28 = vsel %vm1665_vm8, 1.0, %v2541_v24  ;;  %v1602_v10 = vadd.s32 192, %v2863_v57 }
 0x124   : > { %v1844_v21 = vadd.f32 %v1843_v15, %v1813_v41  ;;  %1556 = vst [vmem:[%s2956_s14 + $0x60] sm:$0xff] %v1524_v16  ;;  %v1751_v22 = vmul.f32 %v2992_v32, %v1524_v16  ;;  %v1781_v23 = vadd.f32 %v1780_v13, %v1750_v63  ;;  %v2475_v52 = vadd.f32 %v1384_v19, %v2916_v30 }
 0x125   : > { %v1527_v25 = vadd.f32 %v2474_v17, %v2932_v40  ;;  %v2354_v29 = vpop.f32.mrb[16].mxu1  ;;  %v1816_v34 = vmul.f32 %v1752_v9, %v1525_v14  ;;  %v1635_v49 = vadd.s32 %v2873_v62, %v1602_v10  ;;  %v1605_v46 = vadd.s32 216, %v2863_v57 }
 0x126   : > { %v1782_v61 = vadd.f32 %v1781_v23, %v1751_v22  ;;  %v1815_v26 = vmul.f32 %v1751_v22, %v1524_v16  ;;  %v1845_v32 = vadd.f32 %v1844_v21, %v1814_v18  ;;  %v1526_v53 = vadd.f32 %v2475_v52, %v2932_v40  ;;  %v2410_v30 = vpop.f32.mrb[16].mxu0  ;;  %v1037_v31 = vpop.f32.mrb[17].mxu1 }
 0x127   : > { %1559 = vst [vmem:[%s2956_s14 + $0x78] sm:$0xff] %v1527_v25  ;;  %v1754_v35 = vmul.f32 %v2996_v33, %v1527_v25  ;;  %v2476_v38 = vadd.f32 %v2410_v30, %v2354_v29  ;;  %v1394_v45 = vpop.f32.mrb[17].mxu0  ;;  %v1604_v33 = vadd.s32 208, %v2863_v57  ;;  %vm1668_vm9 = vcmp.lt.s32.totalorder %v1636_v0, 1000 }
 0x128   : > { %v1846_v55 = vadd.f32 %v1845_v32, %v1815_v26  ;;  %1558 = vst [vmem:[%s2956_s14 + $0x70] sm:$0xff] %v1526_v53  ;;  %v1753_v44 = vmul.f32 %v3002_v27, %v1526_v53  ;;  %v1783_v36 = vadd.f32 %v1782_v61, %v1752_v9  ;;  %v2477_v56 = vadd.f32 %v1394_v45, %v1037_v31 }
 0x129   : > { %v1529_v47 = vadd.f32 %v2476_v38, %v2932_v40  ;;  %v2357_v48 = vpop.f32.mrb[18].mxu1  ;;  %v1818_v27 = vmul.f32 %v1754_v35, %v1527_v25  ;;  %vm1667_vm10 = vcmp.lt.s32.totalorder %v1635_v49, 1000  ;;  %v1638_v41 = vadd.s32 %v2873_v62, %v1605_v46 }
 0x12a   : > { %v1784_v54 = vadd.f32 %v1783_v36, %v1753_v44  ;;  %v1817_v4 = vmul.f32 %v1753_v44, %v1526_v53  ;;  %v1847_v60 = vadd.f32 %v1846_v55, %v1816_v34  ;;  %v1528_v1 = vadd.f32 %v2477_v56, %v2932_v40  ;;  %v2413_v50 = vpop.f32.mrb[18].mxu0  ;;  %v1047_v2 = vpop.f32.mrb[19].mxu1 }
 0x12b   : > { %1561 = vst [vmem:[%s2956_s14 + $0x88] sm:$0xff] %v1529_v47  ;;  %v1756_v63 = vmul.f32 %v3007_v39, %v1529_v47  ;;  %v2478_v8 = vadd.f32 %v2413_v50, %v2357_v48  ;;  %v1404_v5 = vpop.f32.mrb[19].mxu0  ;;  %v1637_v15 = vadd.s32 %v2873_v62, %v1604_v33  ;;  %v3109_v22 = vsel %vm1668_vm9, 1.0, %v2541_v24 }
 0x12c   : > { %v1848_v7 = vadd.f32 %v1847_v60, %v1817_v4  ;;  %1560 = vst [vmem:[%s2956_s14 + $0x80] sm:$0xff] %v1528_v1  ;;  %v1755_v37 = vmul.f32 %v3011_v43, %v1528_v1  ;;  %v1785_v11 = vadd.f32 %v1784_v54, %v1754_v35  ;;  %v2479_v12 = vadd.f32 %v1404_v5, %v1047_v2 }
 0x12d   : > { %v1531_v14 = vadd.f32 %v2478_v8, %v2932_v40  ;;  %v2360_v13 = vpop.f32.mrb[20].mxu1  ;;  %v1820_v19 = vmul.f32 %v1756_v63, %v1529_v47  ;;  %v2146_v26 = vsel %vm1667_vm10, 1.0, %v2541_v24  ;;  %vm1670_vm11 = vcmp.lt.s32.totalorder %v1638_v41, 1000 }
 0x12e   : > { %v1786_v39 = vadd.f32 %v1785_v11, %v1755_v37  ;;  %v1819_v16 = vmul.f32 %v1755_v37, %v1528_v1  ;;  %v1849_v59 = vadd.f32 %v1848_v7, %v1818_v27  ;;  %v1530_v18 = vadd.f32 %v2479_v12, %v2932_v40  ;;  %v2416_v9 = vpop.f32.mrb[20].mxu0  ;;  %v1057_v17 = vpop.f32.mrb[21].mxu1 }
 0x12f   : > { %1563 = vst [vmem:[%s2956_s14 + $0x98] sm:$0xff] %v1531_v14  ;;  %v1758_v43 = vmul.f32 %v3024_v51, %v1531_v14  ;;  %v2480_v20 = vadd.f32 %v2416_v9, %v2360_v13  ;;  %v1414_v21 = vpop.f32.mrb[21].mxu0  ;;  %vm1669_vm12 = vcmp.lt.s32.totalorder %v1637_v15, 1000  ;;  %v1607_v0 = vadd.s32 232, %v2863_v57 }
 0x130   : > { %v1850_v23 = vadd.f32 %v1849_v59, %v1819_v16  ;;  %1562 = vst [vmem:[%s2956_s14 + $0x90] sm:$0xff] %v1530_v18  ;;  %v1757_v52 = vmul.f32 %v3027_v58, %v1530_v18  ;;  %v1787_v25 = vadd.f32 %v1786_v39, %v1756_v63  ;;  %v2481_v29 = vadd.f32 %v1414_v21, %v1057_v17 }
 0x131   : > { %v1533_v10 = vadd.f32 %v2480_v20, %v2932_v40  ;;  %v2363_v61 = vpop.f32.mrb[22].mxu1  ;;  %v1822_v35 = vmul.f32 %v1758_v43, %v1531_v14  ;;  %v2149_v49 = vsel %vm1670_vm11, 1.0, %v2541_v24  ;;  %v1606_v46 = vadd.s32 224, %v2863_v57 }
 0x132   : > { %v1788_v51 = vadd.f32 %v1787_v25, %v1757_v52  ;;  %v1821_v32 = vmul.f32 %v1757_v52, %v1530_v18  ;;  %v1851_v53 = vadd.f32 %v1850_v23, %v1820_v19  ;;  %v1532_v30 = vadd.f32 %v2481_v29, %v2932_v40  ;;  %v2419_v31 = vpop.f32.mrb[22].mxu0  ;;  %v1067_v34 = vpop.f32.mrb[23].mxu1 }
 0x133   : > { %1565 = vst [vmem:[%s2956_s14 + $0xa8] sm:$0xff] %v1533_v10  ;;  %v1760_v58 = vmul.f32 %v3058_v6, %v1533_v10  ;;  %v2482_v38 = vadd.f32 %v2419_v31, %v2363_v61  ;;  %v1424_v45 = vpop.f32.mrb[23].mxu0  ;;  %v2148_v6 = vsel %vm1669_vm12, 1.0, %v2541_v24  ;;  %v1640_v8 = vadd.s32 %v2873_v62, %v1607_v0 }
 0x134   : > { %v1852_v55 = vadd.f32 %v1851_v53, %v1821_v32  ;;  %1564 = vst [vmem:[%s2956_s14 + $0xa0] sm:$0xff] %v1532_v30  ;;  %v1759_v44 = vmul.f32 %v3066_v3, %v1532_v30  ;;  %v1789_v36 = vadd.f32 %v1788_v51, %v1758_v43  ;;  %v2483_v56 = vadd.f32 %v1424_v45, %v1067_v34 }
 0x135   : > { %v1535_v47 = vadd.f32 %v2482_v38, %v2932_v40  ;;  %v2366_v48 = vpop.f32.mrb[24].mxu1  ;;  %v1824_v50 = vmul.f32 %v1760_v58, %v1533_v10  ;;  %v1639_v13 = vadd.s32 %v2873_v62, %v1606_v46  ;;  %v1609_v41 = vadd.s32 248, %v2863_v57 }
 0x136   : > { %v1790_v33 = vadd.f32 %v1789_v36, %v1759_v44  ;;  %v1823_v54 = vmul.f32 %v1759_v44, %v1532_v30  ;;  %v1853_v4 = vadd.f32 %v1852_v55, %v1822_v35  ;;  %v1534_v60 = vadd.f32 %v2483_v56, %v2932_v40  ;;  %v2422_v3 = vpop.f32.mrb[24].mxu0  ;;  %v1077_v1 = vpop.f32.mrb[25].mxu1 }
 0x137   : > { %1567 = vst [vmem:[%s2956_s14 + $0xb8] sm:$0xff] %v1535_v47  ;;  %v1762_v2 = vmul.f32 %v3079_v42, %v1535_v47  ;;  %v2484_v27 = vadd.f32 %v2422_v3, %v2366_v48  ;;  %v1434_v63 = vpop.f32.mrb[25].mxu0  ;;  %v1608_v42 = vadd.s32 240, %v2863_v57  ;;  %vm1672_vm13 = vcmp.lt.s32.totalorder %v1640_v8, 1000 }
 0x138   : > { %v1854_v5 = vadd.f32 %v1853_v4, %v1823_v54  ;;  %1566 = vst [vmem:[%s2956_s14 + $0xb0] sm:$0xff] %v1534_v60  ;;  %v1761_v7 = vmul.f32 %v3083_v28, %v1534_v60  ;;  %v1791_v37 = vadd.f32 %v1790_v33, %v1760_v58  ;;  %v2485_v11 = vadd.f32 %v1434_v63, %v1077_v1 }
 0x139   : > { %v1537_v12 = vadd.f32 %v2484_v27, %v2932_v40  ;;  %v2369_v14 = vpop.f32.mrb[26].mxu1  ;;  %v1826_v28 = vmul.f32 %v1762_v2, %v1535_v47  ;;  %vm1671_vm14 = vcmp.lt.s32.totalorder %v1639_v13, 1000  ;;  %v1642_v29 = vadd.s32 %v2873_v62, %v1609_v41 }
 0x13a   : > { %v1792_v15 = vadd.f32 %v1791_v37, %v1761_v7  ;;  %v1825_v39 = vmul.f32 %v1761_v7, %v1534_v60  ;;  %v1855_v16 = vadd.f32 %v1854_v5, %v1824_v50  ;;  %v1536_v59 = vadd.f32 %v2485_v11, %v2932_v40  ;;  %v2425_v18 = vpop.f32.mrb[26].mxu0  ;;  %v1087_v9 = vpop.f32.mrb[27].mxu1 }
 0x13b   : > { %1569 = vst [vmem:[%s2956_s14 + $0xc8] sm:$0xff] %v1537_v12  ;;  %v1764_v17 = vmul.f32 %v3109_v22, %v1537_v12  ;;  %v2486_v19 = vadd.f32 %v2425_v18, %v2369_v14  ;;  %v1444_v43 = vpop.f32.mrb[27].mxu0  ;;  %v1641_v10 = vadd.s32 %v2873_v62, %v1608_v42  ;;  %v2151_v35 = vsel %vm1672_vm13, 1.0, %v2541_v24 }
 0x13c   : > { %v1856_v20 = vadd.f32 %v1855_v16, %v1825_v39  ;;  %1568 = vst [vmem:[%s2956_s14 + $0xc0] sm:$0xff] %v1536_v59  ;;  %v1763_v21 = vmul.f32 %v2146_v26, %v1536_v59  ;;  %v1793_v23 = vadd.f32 %v1792_v15, %v1762_v2  ;;  %v2487_v57 = vadd.f32 %v1444_v43, %v1087_v9 }
 0x13d   : > { %v1539_v52 = vadd.f32 %v2486_v19, %v2932_v40  ;;  %v2372_v25 = vpop.f32.mrb[28].mxu1  ;;  %v1828_v26 = vmul.f32 %v1764_v17, %v1537_v12  ;;  %v2150_v44 = vsel %vm1671_vm14, 1.0, %v2541_v24  ;;  %vm1674_vm15 = vcmp.lt.s32.totalorder %v1642_v29, 1000 }
 0x13e   : > { %v1794_v61 = vadd.f32 %v1793_v23, %v1763_v21  ;;  %v1827_v22 = vmul.f32 %v1763_v21, %v1536_v59  ;;  %v1857_v51 = vadd.f32 %v1856_v20, %v1826_v28  ;;  %v1538_v32 = vadd.f32 %v2487_v57, %v2932_v40  ;;  %v2428_v53 = vpop.f32.mrb[28].mxu0  ;;  %v1097_v30 = vpop.f32.mrb[29].mxu1 }
 0x13f   : > { %1571 = vst [vmem:[%s2956_s14 + $0xd8] sm:$0xff] %v1539_v52  ;;  %v1766_v31 = vmul.f32 %v2149_v49, %v1539_v52  ;;  %v2488_v34 = vadd.f32 %v2428_v53, %v2372_v25  ;;  %v1454_v58 = vpop.f32.mrb[29].mxu0  ;;  %vm1673_vm0 = vcmp.lt.s32.totalorder %v1641_v10, 1000  ;;  %v2153_v63 = vsel %vm1674_vm15, 1.0, %v2541_v24 }
 0x140   : > { %v1858_v38 = vadd.f32 %v1857_v51, %v1827_v22  ;;  %1570 = vst [vmem:[%s2956_s14 + $0xd0] sm:$0xff] %v1538_v32  ;;  %v1765_v45 = vmul.f32 %v2148_v6, %v1538_v32  ;;  %v1795_v62 = vadd.f32 %v1794_v61, %v1764_v17  ;;  %v2489_v0 = vadd.f32 %v1454_v58, %v1097_v30 }
 0x141   : > { %v1541_v55 = vadd.f32 %v2488_v34, %v2932_v40  ;;  %v2375_v36 = vpop.f32.mrb[30].mxu1  ;;  %v1830_v33 = vmul.f32 %v1766_v31, %v1539_v52  ;;  %v2152_v8 = vsel %vm1673_vm0, 1.0, %v2541_v24 }
 0x142   : > { %v1796_v56 = vadd.f32 %v1795_v62, %v1765_v45  ;;  %v1829_v47 = vmul.f32 %v1765_v45, %v1538_v32  ;;  %v1859_v48 = vadd.f32 %v1858_v38, %v1828_v26  ;;  %v1540_v49 = vadd.f32 %v2489_v0, %v2932_v40  ;;  %v2431_v6 = vpop.f32.mrb[30].mxu0  ;;  %v1107_v46 = vpop.f32.mrb[31].mxu1 }
 0x143   : > { %1573 = vst [vmem:[%s2956_s14 + $0xe8] sm:$0xff] %v1541_v55  ;;  %v1768_v54 = vmul.f32 %v2151_v35, %v1541_v55  ;;  %v2490_v4 = vadd.f32 %v2431_v6, %v2375_v36  ;;  %v1464_v60 = vpop.f32.mrb[31].mxu0 }
 0x144   : > { %v1860_v3 = vadd.f32 %v1859_v48, %v1829_v47  ;;  %1572 = vst [vmem:[%s2956_s14 + $0xe0] sm:$0xff] %v1540_v49  ;;  %v1767_v1 = vmul.f32 %v2150_v44, %v1540_v49  ;;  %v1797_v50 = vadd.f32 %v1796_v56, %v1766_v31  ;;  %v2491_v2 = vadd.f32 %v1464_v60, %v1107_v46 }
 0x145   : > { %v1543_v27 = vadd.f32 %v2490_v4, %v2932_v40  ;;  %v1832_v12 = vmul.f32 %v1768_v54, %v1541_v55 }
 0x146   : > { %v1798_v5 = vadd.f32 %v1797_v50, %v1767_v1  ;;  %v1831_v7 = vmul.f32 %v1767_v1, %v1540_v49  ;;  %v1861_v37 = vadd.f32 %v1860_v3, %v1830_v33  ;;  %v1542_v11 = vadd.f32 %v2491_v2, %v2932_v40 }
 0x147   : > { %1575 = vst [vmem:[%s2956_s14 + $0xf8] sm:$0xff] %v1543_v27  ;;  %v1770_v13 = vmul.f32 %v2153_v63, %v1543_v27 }
 0x148   : > { %v1862_v14 = vadd.f32 %v1861_v37, %v1831_v7  ;;  %1574 = vst [vmem:[%s2956_s14 + $0xf0] sm:$0xff] %v1542_v11  ;;  %v1769_v41 = vmul.f32 %v2152_v8, %v1542_v11  ;;  %v1799_v42 = vadd.f32 %v1798_v5, %v1768_v54 }
 0x149   : > { %v1834_v24 = vmul.f32 %v1770_v13, %v1543_v27 }
 0x14a   : > { %v1800_v15 = vadd.f32 %v1799_v42, %v1769_v41  ;;  %v1833_v39 = vmul.f32 %v1769_v41, %v1542_v11  ;;  %v1863_v16 = vadd.f32 %v1862_v14, %v1832_v12 }
 0x14c   : > { %v1801_v59 = vadd.f32 %v1800_v15, %v1770_v13  ;;  %v1864_v18 = vadd.f32 %v1863_v16, %v1833_v39 }
 0x14e   : > { %1802 = vst [vmem:[%s396_s18] sm:$0xff] %v1801_v59  ;;  %v1865_v40 = vadd.f32 %v1864_v18, %v1834_v24 }
 0x150   : > { %1866 = vst [vmem:[%s400_s17] sm:$0xff] %v1865_v40 }
 0x151 PF: > { %s20_s30 = sadd.s32 1, %s2539_s30  }
 0x152   : > { %p17_p5 = scmp.ge.s32.totalorder %s20_s30, 6  }
 0x154   :  { %19 = sbr.rel (!%p17_p5) target bundleno = 1 (0x1), region = 108 }

</bundles_post_ra>
